<compile_context>
chip_gen: v6e
topology: v6e:2x2x1
jax: 0.10.0
libtpu: 0.0.40
codegen_flags: <defaults>
</compile_context>

<pallas_src>
import functools

import jax
import jax.numpy as jnp
from jax.experimental import pallas as pl
from jax.experimental.pallas import tpu as pltpu

_TE_MAX = 4096  # max edge tile (sublanes); multiple of 512
_TE_MIN = 512   # min edge tile


def _edge_tile(num_edges):
    """Largest tile in {512,1024,2048,4096} with >=4 grid steps (amortizes the
    ~0.35 us per-grid-step overhead and keeps both v7x TCs busy); falls back to
    512 for small graphs."""
    te = _TE_MAX
    while te > _TE_MIN and pl.cdiv(num_edges, te) < 4:
        te //= 2
    return te


# ----------------------------------------------------------------------------
# Pallas kernel: one tile of TE edges, all C hetero decoders fused.
# ----------------------------------------------------------------------------
def _hetero_decoder_kernel(feat_ref, lane2c_ref, w0_ref, b0_ref, w1_ref,
                           out_ref, *, n_feat):
    # Layer 0: all C decoders in one lane-packed MXU matmul (bf16 in, f32 acc).
    # The trailing combo-id column of the feature block hits an all-zero W0
    # row, so it contributes nothing here.
    h = jnp.dot(feat_ref[...], w0_ref[...],
                preferred_element_type=jnp.float32)           # (TE, CHP)
    h = jnp.maximum(h + b0_ref[...], 0.0)                     # bias + ReLU (f32)

    # Hetero routing: expand each edge's combo id (last-wins, -1 = no combo)
    # into a one-hot mask over the fused lane dim.  lane2c maps lane -> combo
    # id (weight lanes c*H..c*H+H-1 -> c, bias lane C*H+c -> c, padding -> -2);
    # all values are small exact integers, so the f32 equality is exact.
    cid = feat_ref[:, n_feat:].astype(jnp.float32)            # (TE, 1)
    match = cid == lane2c_ref[...]                            # (TE, CHP)

    # Layer 1 (+ b1 via the constant-1 bias lanes) + select, fused into one
    # broadcast multiply and a single lane reduction (f32 throughout; the XLU
    # reduce hides under the MXU's layer-0 cadence).  Unmatched edges -> 0.
    hw = jnp.where(match, h, 0.0) * w1_ref[...]
    out_ref[...] = jnp.sum(hw, axis=-1, keepdims=True)        # (TE, 1)


# ----------------------------------------------------------------------------
# Wrapper: gathers, combo-id construction, weight fusion/padding, pallas_call.
# ----------------------------------------------------------------------------
def hetero_decoder_forward(x, edge_index, e, volume_id, params, hparams):
    H = hparams["hidden"]
    combos = params["combos"]
    C = len(combos)
    start, end = edge_index[0], edge_index[1]
    E = e.shape[0]

    te = _edge_tile(E)
    E_pad = pl.cdiv(E, te) * te
    pad = E_pad - E

    # Pad only the tiny (E,) index vectors; the big feature slab is then built
    # directly at padded size in a single pass (no jnp.pad over feats).
    start_p = jnp.concatenate([start, jnp.zeros((pad,), start.dtype)])
    end_p = jnp.concatenate([end, jnp.zeros((pad,), end.dtype)])
    eid_p = jnp.concatenate([jnp.arange(E, dtype=jnp.int32),
                             jnp.zeros((pad,), jnp.int32)])

    # Per-edge combo id with last-combo-wins priority (replicates the
    # sequential in-place writes of the PyTorch loop).  -1 => no combo.
    vol_s = volume_id[start_p]
    vol_e = volume_id[end_p]
    cid = jnp.full((E_pad,), -1, jnp.int32)
    for c, (c0, c1) in enumerate(combos):
        v0 = jnp.asarray(hparams["model_ids"][c0]["volume_ids"], jnp.int32)
        v1 = jnp.asarray(hparams["model_ids"][c1]["volume_ids"], jnp.int32)
        m = ((vol_s[:, None] == v0[None, :]).any(axis=-1)
             & (vol_e[:, None] == v1[None, :]).any(axis=-1))
        cid = jnp.where(m, jnp.int32(c), cid)

    # features_to_decode = [x[start] | x[end] | e | combo_id], built once in
    # bf16 at padded size (x pre-cast so the per-edge gather moves bf16).
    NF = 3 * H
    xb = x.astype(jnp.bfloat16)
    feats = jnp.concatenate(
        [xb[start_p], xb[end_p], e[eid_p].astype(jnp.bfloat16),
         cid.astype(jnp.bfloat16)[:, None]], axis=-1)         # (E_pad, 3H+1)

    # ---- fuse the C decoders along lanes, padded to a multiple of 128 -------
    W0, b0, W1, b1 = params["W0"], params["b0"], params["W1"], params["b1"]
    CHP = pl.cdiv(C * H + C, 128) * 128  # C weight blocks of H lanes + C bias lanes

    # W0f[k, c*H + j] = W0[c, k, j]; the extra row NF (combo-id column) is 0.
    W0f = (jnp.zeros((NF + 1, CHP), jnp.float32)
           .at[:NF, :C * H].set(W0.transpose(1, 0, 2).reshape(NF, C * H))
           .astype(jnp.bfloat16))
    # b0f: per-lane layer-0 bias; lanes C*H..C*H+C-1 are constant 1.0 so that
    # h == 1 there and w1f can carry b1 through the same masked reduction.
    b0f = (jnp.zeros((1, CHP), jnp.float32)
           .at[0, :C * H].set(b0.reshape(-1))
           .at[0, C * H:C * H + C].set(1.0))
    # w1f: flattened layer-1 weights + b1 on the bias lanes (f32, resident).
    w1f = (jnp.zeros((1, CHP), jnp.float32)
           .at[0, :C * H].set(W1.reshape(-1))
           .at[0, C * H:C * H + C].set(b1.reshape(-1)))
    # lane -> combo-id map (constant row), f32 for exact compare in-kernel.
    lane_idx = jnp.arange(CHP, dtype=jnp.int32)
    lane2c = (jnp.where(lane_idx < C * H, lane_idx // H,
                        jnp.where(lane_idx < C * H + C, lane_idx - C * H,
                                  jnp.int32(-2)))
              .astype(jnp.float32).reshape(1, CHP))

    kernel = functools.partial(_hetero_decoder_kernel, n_feat=NF)

    out = pl.pallas_call(
        kernel,
        out_shape=jax.ShapeDtypeStruct((E_pad, 1), jnp.float32),
        grid=(E_pad // te,),
        in_specs=[
            pl.BlockSpec((te, NF + 1), lambda i: (i, 0)),   # [feats | combo id] bf16
            pl.BlockSpec((1, CHP), lambda i: (0, 0)),       # lane -> combo map
            pl.BlockSpec((NF + 1, CHP), lambda i: (0, 0)),  # fused W0 (bf16)
            pl.BlockSpec((1, CHP), lambda i: (0, 0)),       # fused b0 (+1.0 bias lanes)
            pl.BlockSpec((1, CHP), lambda i: (0, 0)),       # fused W1 (+ b1)
        ],
        out_specs=pl.BlockSpec((te, 1), lambda i: (i, 0)),
        compiler_params=pltpu.CompilerParams(
            dimension_semantics=("parallel",),
            vmem_limit_bytes=32 * 1024 * 1024,
        ),
    )(feats, lane2c, W0f, b0f, w1f)

    # NOTE: PyTorch uses torch.empty (uninitialized) for edges matching no
    # combo; here those rows are deterministically 0.  Padded rows sliced off.
    return out[:E]


# ----------------------------------------------------------------------------
# Deterministic parameter construction (same shapes as the nn.Module __init__:
# one MLP  Linear(3H,H) -> ReLU -> Linear(H,1)  per combo, nb_edge_layer=1).
# TODO(synk): layernorm/batchnorm and nb_edge_layer>1 variants of make_mlp are
#             not implemented; chosen hparams disable them.
# ----------------------------------------------------------------------------
def init_params(key, hparams):
    H = hparams["hidden"]
    n = len(hparams["model_ids"])
    # torch.combinations(arange(n), r=2, with_replacement=True)
    combos = [(i, j) for i in range(n) for j in range(i, n)]
    C = len(combos)
    k0, k1, k2, k3 = jax.random.split(key, 4)
    W0 = jax.random.normal(k0, (C, 3 * H, H), jnp.float32) / jnp.sqrt(3.0 * H)
    b0 = jax.random.normal(k1, (C, H), jnp.float32) * 0.01
    W1 = jax.random.normal(k2, (C, H), jnp.float32) / jnp.sqrt(1.0 * H)
    b1 = jax.random.normal(k3, (C, 1), jnp.float32) * 0.01
    return {"combos": combos, "W0": W0, "b0": b0, "W1": W1, "b1": b1}


# Pure-JAX reference of the same forward pass (for correctness check).
# Mirrors the kernel's bf16 rounding of feats/W0 (exact bf16 products,
# f32 accumulation); layer-1 math is plain f32 elementwise + reduce.
def reference_forward(x, edge_index, e, volume_id, params, hparams):
    start, end = edge_index[0], edge_index[1]
    feats = jnp.concatenate([x[start], x[end], e], axis=-1)
    featsb = feats.astype(jnp.bfloat16).astype(jnp.float32)
    W0b = params["W0"].astype(jnp.bfloat16).astype(jnp.float32)
    out = jnp.zeros((feats.shape[0], 1), jnp.float32)
    for c, (c0, c1) in enumerate(params["combos"]):
        v0 = jnp.asarray(hparams["model_ids"][c0]["volume_ids"], jnp.int32)
        v1 = jnp.asarray(hparams["model_ids"][c1]["volume_ids"], jnp.int32)
        m = ((volume_id[start][:, None] == v0[None, :]).any(-1)
             & (volume_id[end][:, None] == v1[None, :]).any(-1))
        h = jnp.maximum(
            jnp.dot(featsb, W0b[c], precision=jax.lax.Precision.HIGHEST)
            + params["b0"][c][None, :], 0.0)
        val = (jnp.sum(h * params["W1"][c][None, :], axis=-1, keepdims=True)
               + params["b1"][c])
        out = jnp.where(m[:, None], val, out)
    return out


if __name__ == "__main__":
    hparams = {
        "model_ids": [{"volume_ids": [7, 8, 9]},
                      {"volume_ids": [12, 13, 14]}],
        "hidden": 32,
        "nb_edge_layer": 1,
        "layernorm": False,
        "batchnorm": False,
        "hidden_activation": "ReLU",
    }

    key = jax.random.PRNGKey(0)
    k_x, k_e, k_s, k_t, k_v, k_p = jax.random.split(key, 6)

    # Small graph, but large enough to exercise a multi-tile grid + padding.
    num_nodes, num_edges, H = 500, 6000, hparams["hidden"]
    x = jax.random.normal(k_x, (num_nodes, H), jnp.float32)
    e = jax.random.normal(k_e, (num_edges, H), jnp.float32)
    start = jax.random.randint(k_s, (num_edges,), 0, num_nodes, jnp.int32)
    end = jax.random.randint(k_t, (num_edges,), 0, num_nodes, jnp.int32)
    edge_index = jnp.stack([start, end], axis=0)
    all_vols = jnp.asarray([7, 8, 9, 12, 13, 14], jnp.int32)
    volume_id = all_vols[jax.random.randint(k_v, (num_nodes,), 0, 6, jnp.int32)]

    params = init_params(k_p, hparams)

    out = hetero_decoder_forward(x, edge_index, e, volume_id, params, hparams)
    out = jax.block_until_ready(out)

    ref = reference_forward(x, edge_index, e, volume_id, params, hparams)
    assert out.shape == (num_edges, 1)
    max_err = float(jnp.max(jnp.abs(out - ref)))
    assert jnp.allclose(out, ref, atol=5e-4, rtol=5e-4), (
        f"mismatch vs reference (max abs err {max_err})")

    print("KERNEL_OK")
</pallas_src>

<mosaic_0001>
module attributes {stable_mosaic.version = 11 : i64} {
  func.func @_hetero_decoder_kernel(%arg0: i32, %arg1: memref<1024x97xbf16, #tpu.memory_space<vmem>>, %arg2: memref<1x128xf32, #tpu.memory_space<vmem>>, %arg3: memref<97x128xbf16, #tpu.memory_space<vmem>>, %arg4: memref<1x128xf32, #tpu.memory_space<vmem>>, %arg5: memref<1x128xf32, #tpu.memory_space<vmem>>, %arg6: memref<1024x1xf32, #tpu.memory_space<vmem>>) attributes {dimension_semantics = [#tpu.dimension_semantics<parallel>], iteration_bounds = array<i64: 6>, scalar_prefetch = 0 : i64, scratch_operands = 0 : i64, tpu.core_type = #tpu.core_type<tc>, window_params = [{transform_indices = @transform_0, window_bounds = array<i64: 1024, 97>}, {pipeline_mode = #tpu.pipeline_mode<synchronous>, transform_indices = @transform_1, window_bounds = array<i64: 1, 128>}, {pipeline_mode = #tpu.pipeline_mode<synchronous>, transform_indices = @transform_2, window_bounds = array<i64: 97, 128>}, {pipeline_mode = #tpu.pipeline_mode<synchronous>, transform_indices = @transform_3, window_bounds = array<i64: 1, 128>}, {pipeline_mode = #tpu.pipeline_mode<synchronous>, transform_indices = @transform_4, window_bounds = array<i64: 1, 128>}, {transform_indices = @transform_5, window_bounds = array<i64: 1024, 1>}]} {
    %c0 = arith.constant 0 : index
    %c0_0 = arith.constant 0 : index
    %0 = vector.load %arg1[%c0, %c0_0] : memref<1024x97xbf16, #tpu.memory_space<vmem>>, vector<1024x97xbf16>
    %c0_1 = arith.constant 0 : index
    %c0_2 = arith.constant 0 : index
    %1 = vector.load %arg3[%c0_1, %c0_2] : memref<97x128xbf16, #tpu.memory_space<vmem>>, vector<97x128xbf16>
    %cst = arith.constant dense<0.000000e+00> : vector<1024x128xf32>
    %2 = tpu.matmul %0, %1, %cst {dimension_numbers = #tpu.dot_dimension_numbers<[1], [0], [0], [1], [0, 0, 1, 1], [], []>} : vector<1024x97xbf16>, vector<97x128xbf16>, vector<1024x128xf32> -> vector<1024x128xf32>
    %c0_3 = arith.constant 0 : index
    %c0_4 = arith.constant 0 : index
    %3 = vector.load %arg4[%c0_3, %c0_4] : memref<1x128xf32, #tpu.memory_space<vmem>>, vector<1x128xf32>
    %4 = vector.broadcast %3 : vector<1x128xf32> to vector<1024x128xf32>
    %5 = arith.addf %2, %4 : vector<1024x128xf32>
    %cst_5 = arith.constant 0.000000e+00 : f32
    %6 = vector.broadcast %cst_5 : f32 to vector<1024x128xf32>
    %7 = arith.maximumf %5, %6 : vector<1024x128xf32>
    %c0_6 = arith.constant 0 : index
    %c96 = arith.constant 96 : index
    %8 = vector.load %arg1[%c0_6, %c96] : memref<1024x97xbf16, #tpu.memory_space<vmem>>, vector<1024x1xbf16>
    %9 = arith.extf %8 : vector<1024x1xbf16> to vector<1024x1xf32>
    %c0_7 = arith.constant 0 : index
    %c0_8 = arith.constant 0 : index
    %10 = vector.load %arg2[%c0_7, %c0_8] : memref<1x128xf32, #tpu.memory_space<vmem>>, vector<1x128xf32>
    %11 = vector.broadcast %9 : vector<1024x1xf32> to vector<1024x128xf32>
    %12 = vector.broadcast %10 : vector<1x128xf32> to vector<1024x128xf32>
    %13 = arith.cmpf oeq, %11, %12 : vector<1024x128xf32>
    %cst_9 = arith.constant 0.000000e+00 : f32
    %14 = vector.broadcast %cst_9 : f32 to vector<1024x128xf32>
    %15 = arith.select %13, %7, %14 : vector<1024x128xi1>, vector<1024x128xf32>
    %c0_10 = arith.constant 0 : index
    %c0_11 = arith.constant 0 : index
    %16 = vector.load %arg5[%c0_10, %c0_11] : memref<1x128xf32, #tpu.memory_space<vmem>>, vector<1x128xf32>
    %17 = vector.broadcast %16 : vector<1x128xf32> to vector<1024x128xf32>
    %18 = arith.mulf %15, %17 : vector<1024x128xf32>
    %cst_12 = arith.constant dense<0.000000e+00> : vector<1024xf32>
    %19 = vector.multi_reduction <add>, %18, %cst_12 [1] : vector<1024x128xf32> to vector<1024xf32>
    %20 = vector.shape_cast %19 : vector<1024xf32> to vector<1024x1xf32>
    %c0_13 = arith.constant 0 : index
    %c0_14 = arith.constant 0 : index
    %21 = vector.load %arg6[%c0_13, %c0_14] : memref<1024x1xf32, #tpu.memory_space<vmem>>, vector<1024x1xf32>
    tpu.vector_store %arg6[%c0_13, %c0_14], %20 {strides = array<i32>} : memref<1024x1xf32, #tpu.memory_space<vmem>>, vector<1024x1xf32>,
    return
  }
  func.func @transform_0(%arg0: i32) -> (i32, i32) {
    %c0_i32 = arith.constant 0 : i32
    %c0_i32_0 = arith.constant 0 : i32
    return %arg0, %c0_i32 : i32, i32
  }
  func.func @transform_1(%arg0: i32) -> (i32, i32) {
    %c0_i32 = arith.constant 0 : i32
    %c0_i32_0 = arith.constant 0 : i32
    %c0_i32_1 = arith.constant 0 : i32
    return %c0_i32, %c0_i32_0 : i32, i32
  }
  func.func @transform_2(%arg0: i32) -> (i32, i32) {
    %c0_i32 = arith.constant 0 : i32
    %c0_i32_0 = arith.constant 0 : i32
    %c0_i32_1 = arith.constant 0 : i32
    return %c0_i32, %c0_i32_0 : i32, i32
  }
  func.func @transform_3(%arg0: i32) -> (i32, i32) {
    %c0_i32 = arith.constant 0 : i32
    %c0_i32_0 = arith.constant 0 : i32
    %c0_i32_1 = arith.constant 0 : i32
    return %c0_i32, %c0_i32_0 : i32, i32
  }
  func.func @transform_4(%arg0: i32) -> (i32, i32) {
    %c0_i32 = arith.constant 0 : i32
    %c0_i32_0 = arith.constant 0 : i32
    %c0_i32_1 = arith.constant 0 : i32
    return %c0_i32, %c0_i32_0 : i32, i32
  }
  func.func @transform_5(%arg0: i32) -> (i32, i32) {
    %c0_i32 = arith.constant 0 : i32
    %c0_i32_0 = arith.constant 0 : i32
    return %arg0, %c0_i32 : i32, i32
  }
}

</mosaic_0001>

<bundles_post_ra>
// kernel: tpu_custom_call.1
= control target key start
LH: loop header
LB: loop body
LE: loop exit
PB: predicated region body
PF: predicated region fallthrough
CT: control target
= control target key end

     0   :  { %s4104_s18 = smov 0   ;;  %s5653_s0 = inlined_call_operand.vmem [shape: bf16[6144,97], index: 0, kind: input, shape index: {}]   ;;  %s5654_s1 = inlined_call_operand.vmem [shape: f32[1,128], index: 1, kind: input, shape index: {}]   ;;  %s5655_s2 = inlined_call_operand.vmem [shape: bf16[97,128], index: 2, kind: input, shape index: {}]   ;;  %s5656_s3 = inlined_call_operand.vmem [shape: f32[1,128], index: 3, kind: input, shape index: {}]   ;;  %s5657_s4 = inlined_call_operand.vmem [shape: f32[1,128], index: 4, kind: input, shape index: {}]   ;;  %s5658_s5 = inlined_call_operand.vmem [shape: f32[6144,1], index: 5, kind: output, shape index: {}]  }
   0x1 LB: > { %s3215_s19 = sadd.s32 4294967295, %s4070_s18   ;;  %p3219_p0 = scmp.ge.s32.totalorder %s4070_s18, 1  ;;  %s4070_s18 = sphi %s4104_s18, %s15_s18  }
   0x2   : > { %p188_p1 = scmp.lt.s32.totalorder %s4070_s18, 7 }
   0x4   : > { %p189_p2 = pnand %p3219_p0, %p188_p1 }
   0x6   : > { %192 = sbr.rel (%p189_p2) target bundleno = 639 (0x27f), region = 40 }
   0xb   : > { %v3923_v0 = vld [vmem:[%s5655_s2 + $0x30] ss:$0 sps:$4 sm:$0x11]   ;;  %vm929_vm0 = vcmask 1040384   ;;  %v4072_v1 = vmov 0   ;;  %s3220_s22 = sshll.u32 %s3215_s19, 7 }
   0xc   : > { %v931_v2 = vsel %vm929_vm0, 65535, %v4072_v1  ;;  %v3924_v4 = vld [vmem:[%s5655_s2 + $0x28] sm:$0xff]   ;;  %v4073_v5 = vmov 96   ;;  %p217_p3 = scmp.lt.s32.totalorder %s3220_s22, 767  ;;  %v3926_v6 = vld [vmem:[%s5655_s2 + $0x20] sm:$0xff]   ;;  %v3927_v21 = vld [vmem:[%s5655_s2 + $0x18] sm:$0xff]  }
   0xd   : > { %v933_v3 = vand.u32 %v3923_v0, %v931_v2  ;;  %3612 = vset.pattern.permute.xlu1 %v4073_v5  ;;  %3601 = vset.pattern.permute.xlu0 %v4073_v5  ;;  %v3928_v32 = vld [vmem:[%s5655_s2 + $0x10] sm:$0xff]   ;;  %vm736_vm1 = vcmask 793600   ;;  %v3929_v41 = vld [vmem:[%s5655_s2 + $0x8] sm:$0xff]   ;;  %v3930_v50 = vld [vmem:[%s5655_s2] sm:$0xff]  }
   0xe   : > { %s5671_s22 = smov (!%p217_p3, %s3220_s22), 767 }
   0xf   : > { %3435 = vmatprep.subr.bf16.mxu0 %v933_v3  ;;  %3577 = vmatprep.subr.bf16.mxu1 %v933_v3  ;;  %s3221_s25 = sshll.u32 %s5671_s22, 2  ;;  %s3223_s28 = sshll.u32 %s5671_s22, 3 }
  0x10   : > { %3436 = vmatpush3.bf16.msra.mxu0 %v933_v3  ;;  %3584 = vmatpush3.bf16.msra.mxu1 %v933_v3  ;;  %s4127_s30 = scalar_lea.vmem %s5653_s0, %s3221_s25 }
  0x11   : > { %3437 = vmatprep.subr.bf16.mxu0 %v3924_v4  ;;  %3578 = vmatprep.subr.bf16.mxu1 %v3924_v4  ;;  %v4130_v7 = vld [vmem:[%s4127_s30 + $0x10] sm:$0xff]   ;;  %v229_v8 = vld [vmem:[%s4127_s30] sm:$0xff]   ;;  %v4134_v9 = vld [vmem:[%s4127_s30 + $0x18] sm:$0xff]  }
  0x12   : > { %v1612_v10 = vunpack.c.l.bf16 %v4130_v7  ;;  %v1613_v11 = vunpack.c.h.bf16 %v4130_v7  ;;  %v1608_v12 = vunpack.c.l.bf16 %v229_v8  ;;  %v4139_v13 = vld [vmem:[%s4127_s30 + $0x8] sm:$0xff]   ;;  %v1609_v14 = vunpack.c.h.bf16 %v229_v8  ;;  %v4152_v22 = vld [vmem:[%s4127_s30 + $0x20] sm:$0xff]   ;;  %v4162_v31 = vld [vmem:[%s4127_s30 + $0x38] sm:$0xff]   ;;  %3449 = vmatprep.mubr.msk.bf16.mxu0 %vm736_vm1, %v229_v8 }
  0x13   : > { %v1614_v15 = vunpack.c.l.bf16 %v4134_v9  ;;  %v1615_v16 = vunpack.c.h.bf16 %v4134_v9  ;;  %v1610_v17 = vunpack.c.l.bf16 %v4139_v13  ;;  %v4145_v18 = vld [vmem:[%s4127_s30 + $0x28] sm:$0xff]   ;;  %v1611_v20 = vunpack.c.h.bf16 %v4139_v13  ;;  %v4157_v27 = vld [vmem:[%s4127_s30 + $0x100] sm:$0xff]   ;;  %v4168_v33 = vld [vmem:[%s4127_s30 + $0x30] sm:$0xff]  }
  0x14   : > { %3438 = vmatpush3.bf16.msra.mxu0 %v3924_v4  ;;  %3585 = vmatpush3.bf16.msra.mxu1 %v3924_v4  ;;  %v3613_v19 = vpack.i.bf16 %v1613_v11, %v1612_v10  ;;  %v3602_v23 = vpack.i.bf16 %v1609_v14, %v1608_v12  ;;  %v1618_v25 = vunpack.c.l.bf16 %v4145_v18  ;;  %v1619_v26 = vunpack.c.h.bf16 %v4145_v18  ;;  %v4175_v40 = vld [vmem:[%s4127_s30 + $0x48] sm:$0xff]   ;;  %v4181_v42 = vld [vmem:[%s4127_s30 + $0x40] sm:$0xff]   ;;  %v4191_v49 = vld [vmem:[%s4127_s30 + $0x58] sm:$0xff]  }
  0x15   : > { %3439 = vmatprep.subr.bf16.mxu0 %v3926_v6  ;;  %3579 = vmatprep.subr.bf16.mxu1 %v3926_v6  ;;  %v3618_v24 = vpack.i.bf16 %v1615_v16, %v1614_v15  ;;  %v3607_v28 = vpack.i.bf16 %v1611_v20, %v1610_v17  ;;  %v1616_v29 = vunpack.c.l.bf16 %v4152_v22  ;;  %v1617_v30 = vunpack.c.h.bf16 %v4152_v22  ;;  %v4197_v51 = vld [vmem:[%s4127_s30 + $0x50] sm:$0xff]   ;;  %v4204_v58 = vld [vmem:[%s4127_s30 + $0x108] sm:$0xff]   ;;  %v4210_v60 = vld [vmem:[%s4127_s30 + $0x60] sm:$0xff]  }
  0x16   : > { %3614 = vperm.xlu1 %3612, %v3613_v19   ;;  %3603 = vperm.xlu0 %3601, %v3602_v23   ;;  %v3628_v34 = vpack.i.bf16 %v1619_v26, %v1618_v25  ;;  %v1622_v35 = vunpack.c.l.bf16 %v4162_v31  ;;  %v1623_v36 = vunpack.c.h.bf16 %v4162_v31  ;;  %v1620_v38 = vunpack.c.l.bf16 %v4168_v33  ;;  %v4207_v59 = vld [vmem:[%s4127_s30 + $0x68] sm:$0xff]   ;;  %v4213_v61 = vld [vmem:[%s4127_s30 + $0x110] sm:$0xff]   ;;  %v4220_v4 = vld [vmem:[%s4127_s30 + $0x78] sm:$0xff]  }
  0x17   : > { %v3623_v37 = vpack.i.bf16 %v1617_v30, %v1616_v29  ;;  %v1621_v39 = vunpack.c.h.bf16 %v4168_v33  ;;  %3513 = vmatprep.mubr.msk.bf16.mxu1 %vm736_vm1, %v4157_v27  ;;  %v1626_v44 = vunpack.c.l.bf16 %v4175_v40  ;;  %v1627_v45 = vunpack.c.h.bf16 %v4175_v40  ;;  %v4223_v5 = vld [vmem:[%s4127_s30 + $0x70] sm:$0xff]   ;;  %v4236_v14 = vld [vmem:[%s4127_s30 + $0x118] sm:$0xff]   ;;  %v4239_v15 = vld [vmem:[%s4127_s30 + $0x88] sm:$0xff]  }
  0x18   : > { %3440 = vmatpush3.bf16.msra.mxu0 %v3926_v6  ;;  %3586 = vmatpush3.bf16.msra.mxu1 %v3926_v6  ;;  %v3638_v43 = vpack.i.bf16 %v1623_v36, %v1622_v35  ;;  %v1624_v47 = vunpack.c.l.bf16 %v4181_v42  ;;  %v1625_v48 = vunpack.c.h.bf16 %v4181_v42  ;;  %v1630_v53 = vunpack.c.l.bf16 %v4191_v49  ;;  %v4244_v16 = vld [vmem:[%s4127_s30 + $0x80] sm:$0xff]   ;;  %v4254_v26 = vld [vmem:[%s4127_s30 + $0x98] sm:$0xff]   ;;  %v4270_v35 = vld [vmem:[%s4127_s30 + $0x128] sm:$0xff]  }
  0x19   : > { %3441 = vmatprep.subr.bf16.mxu0 %v3927_v21  ;;  %3580 = vmatprep.subr.bf16.mxu1 %v3927_v21  ;;  %v3633_v46 = vpack.i.bf16 %v1621_v39, %v1620_v38  ;;  %v3648_v52 = vpack.i.bf16 %v1627_v45, %v1626_v44  ;;  %v1631_v54 = vunpack.c.h.bf16 %v4191_v49  ;;  %v1628_v56 = vunpack.c.l.bf16 %v4197_v51  ;;  %v4247_v17 = vld [vmem:[%s4127_s30 + $0x120] sm:$0xff]   ;;  %v4273_v36 = vld [vmem:[%s4127_s30 + $0xa8] sm:$0xff]   ;;  %v4281_v38 = vld [vmem:[%s4127_s30 + $0x130] sm:$0xff]  }
  0x1a   : > { %3619 = vperm.xlu1 %3612, %v3618_v24   ;;  %3608 = vperm.xlu0 %3601, %v3607_v28   ;;  %v3643_v55 = vpack.i.bf16 %v1625_v48, %v1624_v47  ;;  %v1629_v57 = vunpack.c.h.bf16 %v4197_v51  ;;  %v1634_v63 = vunpack.c.l.bf16 %v4207_v59  ;;  %v1635_v0 = vunpack.c.h.bf16 %v4207_v59  ;;  %v4288_v47 = vld [vmem:[%s4127_s30 + $0xb8] sm:$0xff]  }
  0x1b   : > { %v3658_v62 = vpack.i.bf16 %v1631_v54, %v1630_v53  ;;  %v1632_v2 = vunpack.c.l.bf16 %v4210_v60  ;;  %v1633_v3 = vunpack.c.h.bf16 %v4210_v60  ;;  %v1638_v8 = vunpack.c.l.bf16 %v4220_v4 }
  0x1c   : > { %3442 = vmatpush3.bf16.msra.mxu0 %v3927_v21  ;;  %3587 = vmatpush3.bf16.msra.mxu1 %v3927_v21  ;;  %v3653_v1 = vpack.i.bf16 %v1629_v57, %v1628_v56  ;;  %v3668_v6 = vpack.i.bf16 %v1635_v0, %v1634_v63  ;;  %v1639_v10 = vunpack.c.h.bf16 %v4220_v4  ;;  %v1636_v12 = vunpack.c.l.bf16 %v4223_v5  ;;  %v4307_v56 = vld [vmem:[%s4127_s30 + $0xc8] sm:$0xff]   ;;  %v4312_v57 = vld [vmem:[%s4127_s30 + $0xc0] sm:$0xff]  }
  0x1d   : > { %3443 = vmatprep.subr.bf16.mxu0 %v3928_v32  ;;  %3581 = vmatprep.subr.bf16.mxu1 %v3928_v32  ;;  %v3663_v11 = vpack.i.bf16 %v1633_v3, %v1632_v2  ;;  %v1642_v20 = vunpack.c.l.bf16 %v4239_v15  ;;  %v1643_v21 = vunpack.c.h.bf16 %v4239_v15  ;;  %v1640_v24 = vunpack.c.l.bf16 %v4244_v16 }
  0x1e   : > { %3629 = vperm.xlu1 %3612, %v3628_v34   ;;  %3624 = vperm.xlu0 %3601, %v3623_v37   ;;  %v3678_v19 = vpack.i.bf16 %v1639_v10, %v1638_v8  ;;  %v1641_v25 = vunpack.c.h.bf16 %v4244_v16  ;;  %v1646_v29 = vunpack.c.l.bf16 %v4254_v26  ;;  %v1647_v30 = vunpack.c.h.bf16 %v4254_v26  ;;  %v4278_v37 = vld [vmem:[%s4127_s30 + $0xa0] sm:$0xff]   ;;  %v4322_v8 = vld [vmem:[%s4127_s30 + $0xd8] sm:$0xff]  }
  0x1f   : > { %v3688_v28 = vpack.i.bf16 %v1643_v21, %v1642_v20  ;;  %v1648_v45 = vunpack.c.l.bf16 %v4278_v37  ;;  %v1658_v0 = vunpack.c.l.bf16 %v4307_v56  ;;  %v1656_v3 = vunpack.c.l.bf16 %v4312_v57  ;;  %v4338_v20 = vld [vmem:[%s4127_s30 + $0x148] sm:$0xff]  }
  0x20   : > { %3444 = vmatpush3.bf16.msra.mxu0 %v3928_v32  ;;  %3588 = vmatpush3.bf16.msra.mxu1 %v3928_v32  ;;  %v3683_v32 = vpack.i.bf16 %v1641_v25, %v1640_v24  ;;  %v3698_v39 = vpack.i.bf16 %v1647_v30, %v1646_v29  ;;  %v4341_v21 = vld [vmem:[%s4127_s30 + $0xe8] sm:$0xff]   ;;  %v4349_v24 = vld [vmem:[%s4127_s30 + $0x150] sm:$0xff]  }
  0x21   : > { %3445 = vmatprep.subr.bf16.mxu0 %v3929_v41  ;;  %3582 = vmatprep.subr.bf16.mxu1 %v3929_v41  ;;  %v1667_v29 = vunpack.c.h.bf16 %v4341_v21 }
  0x22   : > { %3639 = vperm.xlu1 %3612, %v3638_v43   ;;  %3634 = vperm.xlu0 %3601, %v3633_v46   ;;  %v1651_v43 = vunpack.c.h.bf16 %v4273_v36  ;;  %v1649_v46 = vunpack.c.h.bf16 %v4278_v37 }
  0x24   : > { %3446 = vmatpush3.bf16.msra.mxu0 %v3929_v41  ;;  %3589 = vmatpush3.bf16.msra.mxu1 %v3929_v41  ;;  %v1650_v41 = vunpack.c.l.bf16 %v4273_v36  ;;  %v3703_v53 = vpack.i.bf16 %v1649_v46, %v1648_v45 }
  0x25   : > { %3447 = vmatprep.subr.bf16.mxu0 %v3930_v50  ;;  %3583 = vmatprep.subr.bf16.mxu1 %v3930_v50 }
  0x26   : > { %3649 = vperm.xlu1 %3612, %v3648_v52   ;;  %3644 = vperm.xlu0 %3601, %v3643_v55   ;;  %v3708_v48 = vpack.i.bf16 %v1651_v43, %v1650_v41  ;;  %v1655_v52 = vunpack.c.h.bf16 %v4288_v47  ;;  %v4304_v55 = vld [vmem:[%s4127_s30 + $0x138] sm:$0xff]  }
  0x28   : > { %3448 = vmatpush3.bf16.msra.mxu0 %v3930_v50  ;;  %3590 = vmatpush3.bf16.msra.mxu1 %v3930_v50  ;;  %v1654_v50 = vunpack.c.l.bf16 %v4288_v47 }
  0x2a   : > { %3659 = vperm.xlu1 %3612, %v3658_v62   ;;  %3654 = vperm.xlu0 %3601, %v3653_v1   ;;  %v4315_v62 = vld [vmem:[%s4127_s30 + $0x140] sm:$0xff]   ;;  %v3718_v63 = vpack.i.bf16 %v1655_v52, %v1654_v50  ;;  %v1659_v1 = vunpack.c.h.bf16 %v4307_v56  ;;  %v1674_v52 = vunpack.c.l.bf16 %v4204_v58 }
  0x2b   : > { %3450 = vmatmul.mubr.msk.bf16.vlgmr.msra.gmra.mxu0 %vm736_vm1, %v4139_v13  ;;  %3514 = vmatmul.mubr.msk.bf16.vlgmr.msra.gmra.mxu1 %vm736_vm1, %v4204_v58  ;;  %v1637_v13 = vunpack.c.h.bf16 %v4223_v5 }
  0x2c   : > { %3517 = vmatprep.mubr.msk.bf16.mxu1 %vm736_vm1, %v4213_v61  ;;  %3453 = vmatprep.mubr.msk.bf16.mxu0 %vm736_vm1, %v4130_v7  ;;  %v4257_v7 = vld [vmem:[%s4127_s30 + $0x90] sm:$0xff]   ;;  %v3728_v10 = vpack.i.bf16 %v1659_v1, %v1658_v0  ;;  %v1678_v0 = vunpack.c.l.bf16 %v4236_v14 }
  0x2d   : > { %v3673_v23 = vpack.i.bf16 %v1637_v13, %v1636_v12  ;;  %v1644_v34 = vunpack.c.l.bf16 %v4257_v7  ;;  %v1663_v12 = vunpack.c.h.bf16 %v4322_v8 }
  0x2e   : > { %3669 = vperm.xlu1 %3612, %v3668_v6   ;;  %3664 = vperm.xlu0 %3601, %v3663_v11   ;;  %v1657_v6 = vunpack.c.h.bf16 %v4312_v57  ;;  %v1662_v11 = vunpack.c.l.bf16 %v4322_v8 }
  0x30   : > { %v3723_v13 = vpack.i.bf16 %v1657_v6, %v1656_v3  ;;  %v3738_v25 = vpack.i.bf16 %v1663_v12, %v1662_v11  ;;  %v319_v3 = vld [vmem:[%s4127_s30 + $0x168] sm:$0xff]   ;;  %v1680_v12 = vunpack.c.l.bf16 %v4247_v17 }
  0x32   : > { %3679 = vperm.xlu1 %3612, %v3678_v19   ;;  %3674 = vperm.xlu0 %3601, %v3673_v23   ;;  %v4346_v23 = vld [vmem:[%s4127_s30 + $0xe0] sm:$0xff]  }
  0x33   : > { %3454 = vmatmul.mubr.msk.bf16.gmra.mxu0 %vm736_vm1, %v4134_v9  ;;  %3518 = vmatmul.mubr.msk.bf16.gmra.mxu1 %vm736_vm1, %v4236_v14  ;;  %v1645_v9 = vunpack.c.h.bf16 %v4257_v7 }
  0x34   : > { %3521 = vmatprep.mubr.msk.bf16.mxu1 %vm736_vm1, %v4247_v17  ;;  %3457 = vmatprep.mubr.msk.bf16.mxu0 %vm736_vm1, %v4152_v22  ;;  %v4291_v22 = vld [vmem:[%s4127_s30 + $0xb0] sm:$0xff]  }
  0x35   : > { %v3693_v44 = vpack.i.bf16 %v1645_v9, %v1644_v34  ;;  %v1652_v54 = vunpack.c.l.bf16 %v4291_v22  ;;  %v1665_v34 = vunpack.c.h.bf16 %v4346_v23  ;;  %v4356_v9 = vld [vmem:[%s4127_s30 + $0xf8] sm:$0xff]  }
  0x36   : > { %3689 = vperm.xlu1 %3612, %v3688_v28   ;;  %3684 = vperm.xlu0 %3601, %v3683_v32   ;;  %v1666_v28 = vunpack.c.l.bf16 %v4341_v21  ;;  %v1664_v32 = vunpack.c.l.bf16 %v4346_v23  ;;  %v1670_v41 = vunpack.c.l.bf16 %v4356_v9  ;;  %v1671_v43 = vunpack.c.h.bf16 %v4356_v9 }
  0x38   : > { %v3758_v50 = vpack.i.bf16 %v1671_v43, %v1670_v41  ;;  %v1692_v41 = vunpack.c.l.bf16 %v4349_v24  ;;  %v1693_v43 = vunpack.c.h.bf16 %v4349_v24 }
  0x3a   : > { %3699 = vperm.xlu1 %3612, %v3698_v39   ;;  %3694 = vperm.xlu0 %3601, %v3693_v44   ;;  %v3748_v39 = vpack.i.bf16 %v1667_v29, %v1666_v28  ;;  %v3743_v44 = vpack.i.bf16 %v1665_v34, %v1664_v32  ;;  %v1690_v29 = vunpack.c.l.bf16 %v4338_v20  ;;  %v1688_v32 = vunpack.c.l.bf16 %v4315_v62 }
  0x3b   : > { %3458 = vmatmul.mubr.msk.bf16.gmra.mxu0 %vm736_vm1, %v4145_v18  ;;  %3522 = vmatmul.mubr.msk.bf16.gmra.mxu1 %vm736_vm1, %v4270_v35  ;;  %v1653_v18 = vunpack.c.h.bf16 %v4291_v22  ;;  %v1689_v34 = vunpack.c.h.bf16 %v4315_v62 }
  0x3c   : > { %3525 = vmatprep.mubr.msk.bf16.mxu1 %vm736_vm1, %v4281_v38  ;;  %3461 = vmatprep.mubr.msk.bf16.mxu0 %vm736_vm1, %v4168_v33  ;;  %v4325_v33 = vld [vmem:[%s4127_s30 + $0xd0] sm:$0xff]  }
  0x3d   : > { %v3713_v2 = vpack.i.bf16 %v1653_v18, %v1652_v54  ;;  %v1660_v19 = vunpack.c.l.bf16 %v4325_v33  ;;  %v1672_v54 = vunpack.c.l.bf16 %v4157_v27  ;;  %v1673_v18 = vunpack.c.h.bf16 %v4157_v27 }
  0x3e   : > { %3709 = vperm.xlu1 %3612, %v3708_v48   ;;  %3704 = vperm.xlu0 %3601, %v3703_v53   ;;  %v4372_v48 = vld [vmem:[%s4127_s30 + $0x158] sm:$0xff]   ;;  %v1675_v53 = vunpack.c.h.bf16 %v4204_v58  ;;  %v1679_v58 = vunpack.c.h.bf16 %v4236_v14  ;;  %v1676_v27 = vunpack.c.l.bf16 %v4213_v61  ;;  %v1683_v14 = vunpack.c.h.bf16 %v4270_v35 }
  0x3f   : > { %v3763_v1 = vpack.i.bf16 %v1673_v18, %v1672_v54 }
  0x40   : > { %v3778_v6 = vpack.i.bf16 %v1679_v58, %v1678_v0 }
  0x42   : > { %3719 = vperm.xlu1 %3612, %v3718_v63   ;;  %3714 = vperm.xlu0 %3601, %v3713_v2   ;;  %v1677_v2 = vunpack.c.h.bf16 %v4213_v61  ;;  %v1681_v61 = vunpack.c.h.bf16 %v4247_v17  ;;  %v1685_v17 = vunpack.c.h.bf16 %v4281_v38 }
  0x43   : > { %3462 = vmatmul.mubr.msk.bf16.gmra.mxu0 %vm736_vm1, %v4162_v31  ;;  %3526 = vmatmul.mubr.msk.bf16.gmra.mxu1 %vm736_vm1, %v4304_v55  ;;  %v1661_v31 = vunpack.c.h.bf16 %v4325_v33 }
  0x44   : > { %3529 = vmatprep.mubr.msk.bf16.mxu1 %vm736_vm1, %v4315_v62  ;;  %3465 = vmatprep.mubr.msk.bf16.mxu0 %vm736_vm1, %v4181_v42  ;;  %v4359_v42 = vld [vmem:[%s4127_s30 + $0xf0] sm:$0xff]   ;;  %v3773_v11 = vpack.i.bf16 %v1677_v2, %v1676_v27  ;;  %v327_v62 = vld [vmem:[%s4127_s30 + $0x188] sm:$0xff]  }
  0x45   : > { %v3733_v30 = vpack.i.bf16 %v1661_v31, %v1660_v19  ;;  %v1668_v45 = vunpack.c.l.bf16 %v4359_v42  ;;  %v1669_v46 = vunpack.c.h.bf16 %v4359_v42  ;;  %v1687_v19 = vunpack.c.h.bf16 %v4304_v55 }
  0x46   : > { %3729 = vperm.xlu1 %3612, %v3728_v10   ;;  %3724 = vperm.xlu0 %3601, %v3723_v13   ;;  %v1682_v10 = vunpack.c.l.bf16 %v4270_v35  ;;  %v1686_v13 = vunpack.c.l.bf16 %v4304_v55  ;;  %v3783_v35 = vpack.i.bf16 %v1681_v61, %v1680_v12  ;;  %v1684_v31 = vunpack.c.l.bf16 %v4281_v38  ;;  %v337_v12 = vld [vmem:[%s4127_s30 + $0x1b0] sm:$0xff]  }
  0x47   : > { %v3753_v63 = vpack.i.bf16 %v1669_v46, %v1668_v45  ;;  %v1691_v55 = vunpack.c.h.bf16 %v4338_v20  ;;  %v1694_v38 = vunpack.c.l.bf16 %v4372_v48  ;;  %v1698_v45 = vunpack.c.l.bf16 %v319_v3 }
  0x48   : > { %v3798_v28 = vpack.i.bf16 %v1687_v19, %v1686_v13  ;;  %v1699_v46 = vunpack.c.h.bf16 %v319_v3  ;;  %v1706_v0 = vunpack.c.l.bf16 %v327_v62  ;;  %v1707_v58 = vunpack.c.h.bf16 %v327_v62 }
  0x4a   : > { %3739 = vperm.xlu1 %3612, %v3738_v25   ;;  %3734 = vperm.xlu0 %3601, %v3733_v30   ;;  %v323_v25 = vld [vmem:[%s4127_s30 + $0x178] sm:$0xff]   ;;  %v3793_v30 = vpack.i.bf16 %v1685_v17, %v1684_v31 }
  0x4b   : > { %3466 = vmatmul.mubr.msk.bf16.gmra.mxu0 %vm736_vm1, %v4175_v40  ;;  %3530 = vmatmul.mubr.msk.bf16.gmra.mxu1 %vm736_vm1, %v4338_v20  ;;  %v4377_v40 = vld [vmem:[%s4127_s30 + $0x160] sm:$0xff]   ;;  %v3803_v20 = vpack.i.bf16 %v1689_v34, %v1688_v32  ;;  %v339_v31 = vld [vmem:[%s4127_s30 + $0x1b8] sm:$0xff]  }
  0x4c   : > { %3533 = vmatprep.mubr.msk.bf16.mxu1 %vm736_vm1, %v4349_v24  ;;  %3469 = vmatprep.mubr.msk.bf16.mxu0 %vm736_vm1, %v4197_v51  ;;  %v3768_v51 = vpack.i.bf16 %v1675_v53, %v1674_v52  ;;  %v1697_v52 = vunpack.c.h.bf16 %v4377_v40  ;;  %v1702_v24 = vunpack.c.l.bf16 %v323_v25  ;;  %v1703_v53 = vunpack.c.h.bf16 %v323_v25 }
  0x4e   : > { %3749 = vperm.xlu1 %3612, %v3748_v39   ;;  %3744 = vperm.xlu0 %3601, %v3743_v44   ;;  %v1695_v39 = vunpack.c.h.bf16 %v4372_v48 }
  0x50   : > { %v3818_v44 = vpack.i.bf16 %v1695_v39, %v1694_v38 }
  0x52   : > { %3759 = vperm.xlu1 %3612, %v3758_v50   ;;  %3754 = vperm.xlu0 %3601, %v3753_v63   ;;  %v1696_v50 = vunpack.c.l.bf16 %v4377_v40 }
  0x53   : > { %3470 = vmatmul.mubr.msk.bf16.gmra.mxu0 %vm736_vm1, %v4191_v49  ;;  %3534 = vmatmul.mubr.msk.bf16.gmra.mxu1 %vm736_vm1, %v4372_v48  ;;  %v4397_v49 = vld [vmem:[%s4127_s30 + $0x170] sm:$0xff]   ;;  %v3813_v48 = vpack.i.bf16 %v1693_v43, %v1692_v41 }
  0x54   : > { %3537 = vmatprep.mubr.msk.bf16.mxu1 %vm736_vm1, %v4377_v40  ;;  %3473 = vmatprep.mubr.msk.bf16.mxu0 %vm736_vm1, %v4210_v60  ;;  %v3788_v60 = vpack.i.bf16 %v1683_v14, %v1682_v10  ;;  %v3823_v54 = vpack.i.bf16 %v1697_v52, %v1696_v50  ;;  %v1700_v18 = vunpack.c.l.bf16 %v4397_v49  ;;  %v1701_v63 = vunpack.c.h.bf16 %v4397_v49  ;;  %v333_v40 = vld [vmem:[%s4127_s30 + $0x1a0] sm:$0xff]   ;;  %v345_v41 = vld [vmem:[%s4127_s30 + $0x1d0] sm:$0xff]  }
  0x55   : > { %v1712_v19 = vunpack.c.l.bf16 %v333_v40 }
  0x56   : > { %3769 = vperm.xlu1 %3612, %v3768_v51   ;;  %3764 = vperm.xlu0 %3601, %v3763_v1   ;;  %v331_v51 = vld [vmem:[%s4127_s30 + $0x198] sm:$0xff]   ;;  %v3833_v1 = vpack.i.bf16 %v1701_v63, %v1700_v18  ;;  %v353_v18 = vld [vmem:[%s4127_s30 + $0x1f0] sm:$0xff]  }
  0x5a   : > { %3779 = vperm.xlu1 %3612, %v3778_v6   ;;  %3774 = vperm.xlu0 %3601, %v3773_v11   ;;  %v335_v11 = vld [vmem:[%s4127_s30 + $0x1a8] sm:$0xff]  }
  0x5b   : > { %3474 = vmatmul.mubr.msk.bf16.gmra.mxu0 %vm736_vm1, %v4207_v59  ;;  %3538 = vmatmul.mubr.msk.bf16.gmra.mxu1 %vm736_vm1, %v319_v3  ;;  %v325_v59 = vld [vmem:[%s4127_s30 + $0x180] sm:$0xff]   ;;  %v3848_v3 = vpack.i.bf16 %v1707_v58, %v1706_v0  ;;  %v1714_v61 = vunpack.c.l.bf16 %v335_v11  ;;  %v1733_v0 = vunpack.c.h.bf16 %v353_v18 }
  0x5c   : > { %3541 = vmatprep.mubr.msk.bf16.mxu1 %vm736_vm1, %v4397_v49  ;;  %3477 = vmatprep.mubr.msk.bf16.mxu0 %vm736_vm1, %v4223_v5  ;;  %v3808_v5 = vpack.i.bf16 %v1691_v55, %v1690_v29  ;;  %v1704_v27 = vunpack.c.l.bf16 %v325_v59  ;;  %v1705_v2 = vunpack.c.h.bf16 %v325_v59  ;;  %v1710_v49 = vunpack.c.l.bf16 %v331_v51  ;;  %v343_v55 = vld [vmem:[%s4127_s30 + $0x1c8] sm:$0xff]  }
  0x5d   : > { %v1717_v29 = vunpack.c.h.bf16 %v337_v12  ;;  %v1722_v32 = vunpack.c.l.bf16 %v343_v55  ;;  %v1723_v34 = vunpack.c.h.bf16 %v343_v55 }
  0x5e   : > { %3789 = vperm.xlu1 %3612, %v3788_v60   ;;  %3784 = vperm.xlu0 %3601, %v3783_v35   ;;  %v3843_v6 = vpack.i.bf16 %v1705_v2, %v1704_v27  ;;  %v1715_v60 = vunpack.c.h.bf16 %v335_v11  ;;  %v1713_v35 = vunpack.c.h.bf16 %v333_v40 }
  0x60   : > { %v3868_v17 = vpack.i.bf16 %v1715_v60, %v1714_v61 }
  0x62   : > { %3799 = vperm.xlu1 %3612, %v3798_v28   ;;  %3794 = vperm.xlu0 %3601, %v3793_v30   ;;  %v1716_v28 = vunpack.c.l.bf16 %v337_v12  ;;  %v341_v30 = vld [vmem:[%s4127_s30 + $0x1c0] sm:$0xff]  }
  0x63   : > { %3478 = vmatmul.mubr.msk.bf16.gmra.mxu0 %vm736_vm1, %v4220_v4  ;;  %3542 = vmatmul.mubr.msk.bf16.gmra.mxu1 %vm736_vm1, %v323_v25  ;;  %v329_v4 = vld [vmem:[%s4127_s30 + $0x190] sm:$0xff]   ;;  %v1719_v25 = vunpack.c.h.bf16 %v339_v31  ;;  %v1720_v38 = vunpack.c.l.bf16 %v341_v30  ;;  %v1721_v39 = vunpack.c.h.bf16 %v341_v30 }
  0x64   : > { %3545 = vmatprep.mubr.msk.bf16.mxu1 %vm736_vm1, %v325_v59  ;;  %3481 = vmatprep.mubr.msk.bf16.mxu0 %vm736_vm1, %v4244_v16  ;;  %v3828_v16 = vpack.i.bf16 %v1699_v46, %v1698_v45  ;;  %v1708_v10 = vunpack.c.l.bf16 %v329_v4  ;;  %v1709_v14 = vunpack.c.h.bf16 %v329_v4  ;;  %v3863_v59 = vpack.i.bf16 %v1713_v35, %v1712_v19  ;;  %v351_v46 = vld [vmem:[%s4127_s30 + $0x1e8] sm:$0xff]  }
  0x65   : > { %v1725_v45 = vunpack.c.h.bf16 %v345_v41  ;;  %v1730_v50 = vunpack.c.l.bf16 %v351_v46  ;;  %v1731_v52 = vunpack.c.h.bf16 %v351_v46 }
  0x66   : > { %3809 = vperm.xlu1 %3612, %v3808_v5   ;;  %3804 = vperm.xlu0 %3601, %v3803_v20   ;;  %v3853_v13 = vpack.i.bf16 %v1709_v14, %v1708_v10  ;;  %v3873_v5 = vpack.i.bf16 %v1717_v29, %v1716_v28  ;;  %v347_v20 = vld [vmem:[%s4127_s30 + $0x1d8] sm:$0xff]  }
  0x67   : > { %v1726_v43 = vunpack.c.l.bf16 %v347_v20  ;;  %v3908_v63 = vpack.i.bf16 %v1731_v52, %v1730_v50 }
  0x6a   : > { %3819 = vperm.xlu1 %3612, %v3818_v44   ;;  %3814 = vperm.xlu0 %3601, %v3813_v48   ;;  %v1724_v44 = vunpack.c.l.bf16 %v345_v41  ;;  %v349_v48 = vld [vmem:[%s4127_s30 + $0x1e0] sm:$0xff]  }
  0x6b   : > { %3482 = vmatmul.mubr.msk.bf16.gmra.mxu0 %vm736_vm1, %v4239_v15  ;;  %3546 = vmatmul.mubr.msk.bf16.gmra.mxu1 %vm736_vm1, %v327_v62  ;;  %v3838_v15 = vpack.i.bf16 %v1703_v53, %v1702_v24  ;;  %v1727_v62 = vunpack.c.h.bf16 %v347_v20  ;;  %v1728_v24 = vunpack.c.l.bf16 %v349_v48  ;;  %v1729_v53 = vunpack.c.h.bf16 %v349_v48 }
  0x6c   : > { %3549 = vmatprep.mubr.msk.bf16.mxu1 %vm736_vm1, %v329_v4  ;;  %3485 = vmatprep.mubr.msk.bf16.mxu0 %vm736_vm1, %v4257_v7  ;;  %v1711_v7 = vunpack.c.h.bf16 %v331_v51  ;;  %v3883_v4 = vpack.i.bf16 %v1721_v39, %v1720_v38 }
  0x6e   : > { %3829 = vperm.xlu1 %3612, %v3828_v16   ;;  %3824 = vperm.xlu0 %3601, %v3823_v54   ;;  %v3893_v16 = vpack.i.bf16 %v1725_v45, %v1724_v44  ;;  %v355_v54 = vld [vmem:[%s4127_s30 + $0x1f8] sm:$0xff]   ;;  %s5045_s30 = scalar_lea.vmem %s5658_s5, %s3223_s28 }
  0x72   : > { %3839 = vperm.xlu1 %3612, %v3838_v15   ;;  %3834 = vperm.xlu0 %3601, %v3833_v1   ;;  %v1732_v15 = vunpack.c.l.bf16 %v353_v18 }
  0x73   : > { %3486 = vmatmul.mubr.msk.bf16.gmra.mxu0 %vm736_vm1, %v4254_v26  ;;  %3550 = vmatmul.mubr.msk.bf16.gmra.mxu1 %vm736_vm1, %v331_v51  ;;  %v3858_v26 = vpack.i.bf16 %v1711_v7, %v1710_v49  ;;  %v1734_v51 = vunpack.c.l.bf16 %v355_v54 }
  0x74   : > { %3553 = vmatprep.mubr.msk.bf16.mxu1 %vm736_vm1, %v333_v40  ;;  %3489 = vmatprep.mubr.msk.bf16.mxu0 %vm736_vm1, %v4278_v37  ;;  %v1718_v37 = vunpack.c.l.bf16 %v339_v31  ;;  %v3903_v40 = vpack.i.bf16 %v1729_v53, %v1728_v24  ;;  %v3913_v1 = vpack.i.bf16 %v1733_v0, %v1732_v15 }
  0x76   : > { %3849 = vperm.xlu1 %3612, %v3848_v3   ;;  %3844 = vperm.xlu0 %3601, %v3843_v6  }
  0x7a   : > { %3859 = vperm.xlu1 %3612, %v3858_v26   ;;  %3854 = vperm.xlu0 %3601, %v3853_v13  }
  0x7b   : > { %3490 = vmatmul.mubr.msk.bf16.gmra.mxu0 %vm736_vm1, %v4273_v36  ;;  %3554 = vmatmul.mubr.msk.bf16.gmra.mxu1 %vm736_vm1, %v335_v11  ;;  %v3878_v36 = vpack.i.bf16 %v1719_v25, %v1718_v37 }
  0x7c   : > { %3557 = vmatprep.mubr.msk.bf16.mxu1 %vm736_vm1, %v337_v12  ;;  %3493 = vmatprep.mubr.msk.bf16.mxu0 %vm736_vm1, %v4291_v22  ;;  %v3888_v22 = vpack.i.bf16 %v1723_v34, %v1722_v32 }
  0x7e   : > { %3869 = vperm.xlu1 %3612, %v3868_v17   ;;  %3864 = vperm.xlu0 %3601, %v3863_v59  }
  0x82   : > { %3879 = vperm.xlu1 %3612, %v3878_v36   ;;  %3874 = vperm.xlu0 %3601, %v3873_v5   ;;  %v4561_v36 = vld [vmem:[%s5656_s3] ss:$0 sm:$0xff] }
  0x83   : > { %3494 = vmatmul.mubr.msk.bf16.gmra.mxu0 %vm736_vm1, %v4288_v47  ;;  %3558 = vmatmul.mubr.msk.bf16.gmra.mxu1 %vm736_vm1, %v339_v31  ;;  %v3898_v47 = vpack.i.bf16 %v1727_v62, %v1726_v43 }
  0x84   : > { %3561 = vmatprep.mubr.msk.bf16.mxu1 %vm736_vm1, %v341_v30  ;;  %3497 = vmatprep.mubr.msk.bf16.mxu0 %vm736_vm1, %v4312_v57  ;;  %v1735_v57 = vunpack.c.h.bf16 %v355_v54 }
  0x86   : > { %3889 = vperm.xlu1 %3612, %v3888_v22   ;;  %3884 = vperm.xlu0 %3601, %v3883_v4   ;;  %v3918_v58 = vpack.i.bf16 %v1735_v57, %v1734_v51 }
  0x8a   : > { %3899 = vperm.xlu1 %3612, %v3898_v47   ;;  %3894 = vperm.xlu0 %3601, %v3893_v16   ;;  %v4576_v47 = vld [vmem:[%s5654_s1] ss:$0 sm:$0xff] }
  0x8b   : > { %3498 = vmatmul.mubr.msk.bf16.gmra.mxu0 %vm736_vm1, %v4307_v56  ;;  %3562 = vmatmul.mubr.msk.bf16.gmra.mxu1 %vm736_vm1, %v343_v55  ;;  %v4582_v16 = vld [vmem:[%s5657_s4] ss:$0 sm:$0xff] }
  0x8c   : > { %3565 = vmatprep.mubr.msk.bf16.mxu1 %vm736_vm1, %v345_v41  ;;  %3501 = vmatprep.mubr.msk.bf16.mxu0 %vm736_vm1, %v4325_v33 }
  0x8e   : > { %3909 = vperm.xlu1 %3612, %v3908_v63   ;;  %3904 = vperm.xlu0 %3601, %v3903_v40  }
  0x91   : > { %v4479_v56 = vpop.permute.xlu1 %3614  ;;  %v4483_v27 = vpop.permute.xlu0 %3603 }
  0x92   : > { %3919 = vperm.xlu1 %3612, %v3918_v58   ;;  %3914 = vperm.xlu0 %3601, %v3913_v1   ;;  %v3605_v50 = vunpack.i.l.bf16 %v4483_v27 }
  0x93   : > { %3502 = vmatmul.mubr.msk.bf16.gmra.mxu0 %vm736_vm1, %v4322_v8  ;;  %3566 = vmatmul.mubr.msk.bf16.gmra.mxu1 %vm736_vm1, %v347_v20 }
  0x94   : > { %3505 = vmatprep.mubr.msk.bf16.mxu0 %vm736_vm1, %v4346_v23  ;;  %3569 = vmatprep.mubr.msk.bf16.mxu1 %vm736_vm1, %v349_v48  ;;  %vm2383_vm4 = vcmp.eq.f32.partialorder %v3605_v50, %v4576_v47 }
  0x95   : > { %v4489_v33 = vpop.permute.xlu1 %3619  ;;  %v4491_v2 = vpop.permute.xlu0 %3608 }
  0x96   : > { %v3610_v5 = vunpack.i.l.bf16 %v4491_v2 }
  0x98   : > { %vm2385_vm2 = vcmp.eq.f32.partialorder %v3610_v5, %v4576_v47  ;;  %v3611_v5 = vunpack.i.h.bf16 %v4491_v2  ;;  %v3621_v2 = vunpack.i.l.bf16 %v4489_v33 }
  0x99   : > { %v4493_v3 = vpop.permute.xlu1 %3629  ;;  %v4497_v8 = vpop.permute.xlu0 %3624 }
  0x9a   : > { %vm2386_vm7 = vcmp.eq.f32.partialorder %v3611_v5, %v4576_v47  ;;  %vm2389_vm8 = vcmp.eq.f32.partialorder %v3621_v2, %v4576_v47 }
  0x9b   : > { %3506 = vmatmul.mubr.msk.bf16.gmra.mxu0 %vm736_vm1, %v4341_v21  ;;  %3570 = vmatmul.mubr.msk.bf16.gmra.mxu1 %vm736_vm1, %v351_v46 }
  0x9c   : > { %3509 = vmatprep.mubr.msk.bf16.mxu0 %vm736_vm1, %v4359_v42  ;;  %3573 = vmatprep.mubr.msk.bf16.mxu1 %vm736_vm1, %v353_v18 }
  0x9d   : > { %v4503_v23 = vpop.permute.xlu1 %3639  ;;  %v4505_v49 = vpop.permute.xlu0 %3634 }
  0xa1   : > { %v4507_v7 = vpop.permute.xlu1 %3649  ;;  %v4512_v21 = vpop.permute.xlu0 %3644 }
  0xa3   : > { %3510 = vmatmul.mubr.msk.bf16.gmra.mxu0 %vm736_vm1, %v4356_v9  ;;  %3574 = vmatmul.mubr.msk.bf16.gmra.mxu1 %vm736_vm1, %v355_v54 }
  0xa5   : > { %v4514_v6 = vpop.permute.xlu1 %3659  ;;  %v4516_v10 = vpop.permute.xlu0 %3654 }
  0xa9   : > { %v4518_v42 = vpop.permute.xlu1 %3669  ;;  %v4520_v14 = vpop.permute.xlu0 %3664 }
  0xad   : > { %v4522_v11 = vpop.permute.xlu1 %3679  ;;  %v4524_v12 = vpop.permute.xlu0 %3674 }
  0xb1   : > { %v4526_v26 = vpop.permute.xlu1 %3689  ;;  %v4528_v61 = vpop.permute.xlu0 %3684 }
  0xb5   : > { %v4530_v9 = vpop.permute.xlu1 %3699  ;;  %v4532_v60 = vpop.permute.xlu0 %3694 }
  0xb9   : > { %v4534_v13 = vpop.permute.xlu1 %3709  ;;  %v4536_v19 = vpop.permute.xlu0 %3704 }
  0xbd   : > { %v4538_v35 = vpop.permute.xlu1 %3719  ;;  %v4540_v31 = vpop.permute.xlu0 %3714 }
  0xc1   : > { %v4542_v17 = vpop.permute.xlu1 %3729  ;;  %v4544_v37 = vpop.permute.xlu0 %3724 }
  0xc5   : > { %v4546_v25 = vpop.permute.xlu1 %3739  ;;  %v4548_v59 = vpop.permute.xlu0 %3734 }
  0xc9   : > { %v4550_v28 = vpop.permute.xlu1 %3749  ;;  %v4552_v29 = vpop.permute.xlu0 %3744 }
  0xcd   : > { %v4554_v55 = vpop.permute.xlu1 %3759  ;;  %v4556_v30 = vpop.permute.xlu0 %3754 }
  0xd1   : > { %v4563_v32 = vpop.permute.xlu1 %3769  ;;  %v4569_v43 = vpop.permute.xlu0 %3764 }
  0xd2   : > { %v3771_v20 = vunpack.i.l.bf16 %v4563_v32  ;;  %v3766_v24 = vunpack.i.l.bf16 %v4569_v43 }
  0xd4   : > { %vm2449_vm3 = vcmp.eq.f32.partialorder %v3771_v20, %v4576_v47  ;;  %vm2447_vm5 = vcmp.eq.f32.partialorder %v3766_v24, %v4576_v47 }
  0xeb   : > { %v3451_v34 = vpop.f32.mrf.mxu0  ;;  %v3515_v39 = vpop.f32.mrf.mxu1 }
  0xec   : > { %v978_v38 = vadd.f32 %v3451_v34, %v4561_v36  ;;  %v1234_v41 = vadd.f32 %v3515_v39, %v4561_v36  ;;  %v3606_v34 = vunpack.i.h.bf16 %v4483_v27 }
  0xed   : > { %v969_v22 = vpop.f32.mrf.mxu0  ;;  %v1225_v4 = vpop.f32.mrf.mxu1 }
  0xee   : > { %v1482_v62 = vmax.f32 %v978_v38, 0.0  ;;  %v970_v44 = vadd.f32 %v4561_v36, %v969_v22  ;;  %v1546_v45 = vmax.f32 %v1234_v41, 0.0  ;;  %v1226_v46 = vadd.f32 %v4561_v36, %v1225_v4 }
  0xef   : > { %v3452_v48 = vpop.f32.mrf.mxu0  ;;  %v3516_v52 = vpop.f32.mrf.mxu1  ;;  %vm2384_vm6 = vcmp.eq.f32.partialorder %v3606_v34, %v4576_v47 }
  0xf0   : > { %v1480_v53 = vmax.f32 %v970_v44, 0.0  ;;  %v981_v54 = vadd.f32 %v3452_v48, %v4561_v36  ;;  %v1544_v63 = vmax.f32 %v1226_v46, 0.0  ;;  %v2577_v57 = vsel %vm2449_vm3, %v1546_v45, 0.0 }
  0xf1   : > { %v972_v18 = vpop.f32.mrf.mxu0  ;;  %v2513_v40 = vsel %vm2385_vm2, %v1482_v62, 0.0  ;;  %v1228_v15 = vpop.f32.mrf.mxu1  ;;  %v2712_v0 = vmul.f32 %v4582_v16, %v2577_v57  ;;  %v1237_v39 = vadd.f32 %v3516_v52, %v4561_v36  ;;  %v3772_v48 = vunpack.i.h.bf16 %v4563_v32 }
  0xf2   : > { %v973_v51 = vadd.f32 %v4561_v36, %v972_v18  ;;  %v2648_v58 = vmul.f32 %v4582_v16, %v2513_v40  ;;  %v1483_v38 = vmax.f32 %v981_v54, 0.0  ;;  %v2575_v62 = vsel %vm2447_vm5, %v1544_v63, 0.0 }
  0xf3   : > { %v3455_v1 = vpop.f32.mrf.mxu0  ;;  %2906 = vadd.xlane.f32.xlu1 %v2712_v0  ;;  %v2511_v4 = vsel %vm2383_vm4, %v1480_v53, 0.0  ;;  %v3519_v44 = vpop.f32.mrf.mxu1  ;;  %v2710_v27 = vmul.f32 %v4582_v16, %v2575_v62  ;;  %v1547_v50 = vmax.f32 %v1237_v39, 0.0  ;;  %v1229_v52 = vadd.f32 %v4561_v36, %v1228_v15 }
  0xf4   : > { %2778 = vadd.xlane.f32.xlu0 %v2648_v58  ;;  %v1481_v41 = vmax.f32 %v973_v51, 0.0  ;;  %v994_v22 = vadd.f32 %v3455_v1, %v4561_v36  ;;  %v2646_v46 = vmul.f32 %v4582_v16, %v2511_v4  ;;  %v4604_v53 = vpop.permute.xlu1 %3779  ;;  %v1250_v54 = vadd.f32 %v3519_v44, %v4561_v36 }
  0xf5   : > { %v985_v20 = vpop.f32.mrf.mxu0  ;;  %v2514_v51 = vsel %vm2386_vm7, %v1483_v38, 0.0  ;;  %v1241_v57 = vpop.f32.mrf.mxu1  ;;  %v3767_v15 = vunpack.i.h.bf16 %v4569_v43  ;;  %v3781_v58 = vunpack.i.l.bf16 %v4604_v53  ;;  %v1545_v1 = vmax.f32 %v1229_v52, 0.0 }
  0xf6   : > { %v1486_v18 = vmax.f32 %v994_v22, 0.0  ;;  %v2512_v63 = vsel %vm2384_vm6, %v1481_v41, 0.0  ;;  %v2649_v32 = vmul.f32 %v4582_v16, %v2514_v51  ;;  %v986_v34 = vadd.f32 %v4561_v36, %v985_v20 }
  0xf7   : > { %v3456_v45 = vpop.f32.mrf.mxu0  ;;  %2902 = vadd.xlane.f32.xlu1 %v2710_v27  ;;  %v2647_v0 = vmul.f32 %v4582_v16, %v2512_v63  ;;  %vm2450_vm9 = vcmp.eq.f32.partialorder %v3772_v48, %v4576_v47  ;;  %v1550_v38 = vmax.f32 %v1250_v54, 0.0  ;;  %v3520_v62 = vpop.f32.mrf.mxu1  ;;  %v3616_v20 = vunpack.i.l.bf16 %v4479_v56 }
  0xf8   : > { %2774 = vadd.xlane.f32.xlu0 %v2646_v46  ;;  %v997_v39 = vadd.f32 %v3456_v45, %v4561_v36  ;;  %v2517_v41 = vsel %vm2389_vm8, %v1486_v18, 0.0  ;;  %v2578_v22 = vsel %vm2450_vm9, %v1547_v50, 0.0  ;;  %v3622_v27 = vunpack.i.h.bf16 %v4489_v33  ;;  %v4628_v45 = vpop.permute.xlu0 %3774 }
  0xf9   : > { %v988_v24 = vpop.f32.mrf.mxu0  ;;  %v2652_v4 = vmul.f32 %v4582_v16, %v2517_v41  ;;  %v2713_v44 = vmul.f32 %v4582_v16, %v2578_v22  ;;  %v1242_v46 = vadd.f32 %v4561_v36, %v1241_v57  ;;  %v1484_v2 = vmax.f32 %v986_v34, 0.0  ;;  %v1244_v63 = vpop.f32.mrf.mxu1 }
  0xfa   : > { %vm2453_vm10 = vcmp.eq.f32.partialorder %v3781_v58, %v4576_v47  ;;  %vm2448_vm11 = vcmp.eq.f32.partialorder %v3767_v15, %v4576_v47  ;;  %v1253_v50 = vadd.f32 %v3520_v62, %v4561_v36  ;;  %v1487_v52 = vmax.f32 %v997_v39, 0.0 }
  0xfb   : > { %v3459_v40 = vpop.f32.mrf.mxu0  ;;  %2776 = vadd.xlane.f32.xlu1 %v2647_v0  ;;  %v2581_v54 = vsel %vm2453_vm10, %v1550_v38, 0.0  ;;  %v2576_v18 = vsel %vm2448_vm11, %v1545_v1, 0.0  ;;  %vm2387_vm12 = vcmp.eq.f32.partialorder %v3616_v20, %v4576_v47  ;;  %vm2390_vm13 = vcmp.eq.f32.partialorder %v3622_v27, %v4576_v47  ;;  %v3523_v22 = vpop.f32.mrf.mxu1 }
  0xfc   : > { %2780 = vadd.xlane.f32.xlu0 %v2649_v32  ;;  %v2716_v51 = vmul.f32 %v4582_v16, %v2581_v54  ;;  %v2711_v57 = vmul.f32 %v4582_v16, %v2576_v18  ;;  %v3782_v0 = vunpack.i.h.bf16 %v4604_v53  ;;  %v3776_v32 = vunpack.i.l.bf16 %v4628_v45 }
  0xfd   : > { %v4613_v5 = vpop.f32.mrf.mxu0  ;;  %v1548_v15 = vmax.f32 %v1242_v46, 0.0  ;;  %v989_v58 = vadd.f32 %v4561_v36, %v988_v24  ;;  %v1551_v34 = vmax.f32 %v1253_v50, 0.0  ;;  %v1010_v38 = vadd.f32 %v3459_v40, %v4561_v36  ;;  %v4653_v40 = vpop.permute.xlu1 %3789 }
  0xfe   : > { %v2515_v39 = vsel %vm2387_vm12, %v1484_v2, 0.0  ;;  %v2518_v41 = vsel %vm2390_vm13, %v1487_v52, 0.0  ;;  %v3631_v24 = vunpack.i.l.bf16 %v4493_v3  ;;  %vm2451_vm14 = vcmp.eq.f32.partialorder %v3776_v32, %v4576_v47 }
  0xff   : > { %v4617_v43 = vpop.f32.mrf.mxu0  ;;  %2786 = vadd.xlane.f32.xlu1 %v2652_v4  ;;  %v2650_v4 = vmul.f32 %v4582_v16, %v2515_v39  ;;  %v2653_v53 = vmul.f32 %v4582_v16, %v2518_v41  ;;  %v1485_v20 = vmax.f32 %v989_v58, 0.0  ;;  %vm2454_vm15 = vcmp.eq.f32.partialorder %v3782_v0, %v4576_v47 }
 0x100   : > { %2908 = vadd.xlane.f32.xlu0 %v2713_v44  ;;  %v3617_v44 = vunpack.i.h.bf16 %v4479_v56  ;;  %v1490_v46 = vmax.f32 %v1010_v38, 0.0  ;;  %v1266_v2 = vadd.f32 %v3523_v22, %v4561_v36  ;;  %v2579_v50 = vsel %vm2451_vm14, %v1548_v15, 0.0 }
 0x101   : > { %v4624_v48 = vpop.f32.mrf.mxu0  ;;  %v2582_v52 = vsel %vm2454_vm15, %v1551_v34, 0.0  ;;  %v2714_v56 = vmul.f32 %v4582_v16, %v2579_v50  ;;  %v3791_v32 = vunpack.i.l.bf16 %v4653_v40  ;;  %vm2393_vm0 = vcmp.eq.f32.partialorder %v3631_v24, %v4576_v47 }
 0x102   : > { %v2717_v18 = vmul.f32 %v4582_v16, %v2582_v52  ;;  %vm2388_vm1 = vcmp.eq.f32.partialorder %v3617_v44, %v4576_v47  ;;  %v1554_v15 = vmax.f32 %v1266_v2, 0.0  ;;  %v1002_v58 = vadd.f32 %v4561_v36, %v4613_v5 }
 0x103   : > { %v4631_v33 = vpop.f32.mrf.mxu0  ;;  %2914 = vadd.xlane.f32.xlu1 %v2716_v51  ;;  %v1245_v51 = vadd.f32 %v4561_v36, %v1244_v63  ;;  %v2521_v34 = vsel %vm2393_vm0, %v1490_v46, 0.0  ;;  %v2516_v38 = vsel %vm2388_vm1, %v1485_v20, 0.0  ;;  %v3777_v39 = vunpack.i.h.bf16 %v4628_v45  ;;  %v4679_v45 = vpop.permute.xlu0 %3784 }
 0x104   : > { %2904 = vadd.xlane.f32.xlu0 %v2711_v57  ;;  %v1257_v57 = vpop.f32.mrf.mxu1  ;;  %v2656_v41 = vmul.f32 %v4582_v16, %v2521_v34  ;;  %v2651_v22 = vmul.f32 %v4582_v16, %v2516_v38  ;;  %v3626_v44 = vunpack.i.l.bf16 %v4497_v8  ;;  %vm2457_vm2 = vcmp.eq.f32.partialorder %v3791_v32, %v4576_v47 }
 0x105   : > { %v4640_v1 = vpop.f32.mrf.mxu0  ;;  %v1258_v20 = vadd.f32 %v4561_v36, %v1257_v57  ;;  %v1488_v46 = vmax.f32 %v1002_v58, 0.0  ;;  %v2585_v2 = vsel %vm2457_vm2, %v1554_v15, 0.0  ;;  %v3632_v50 = vunpack.i.h.bf16 %v4493_v3 }
 0x106   : > { %v3524_v24 = vpop.f32.mrf.mxu1  ;;  %vm2452_vm3 = vcmp.eq.f32.partialorder %v3777_v39, %v4576_v47  ;;  %v3786_v32 = vunpack.i.l.bf16 %v4679_v45  ;;  %vm2391_vm4 = vcmp.eq.f32.partialorder %v3626_v44, %v4576_v47  ;;  %v1026_v15 = vadd.f32 %v4631_v33, %v4561_v36 }
 0x107   : > { %v4643_v62 = vpop.f32.mrf.mxu0  ;;  %2782 = vadd.xlane.f32.xlu1 %v2650_v4  ;;  %v1549_v4 = vmax.f32 %v1245_v51, 0.0  ;;  %v1552_v3 = vmax.f32 %v1258_v20, 0.0  ;;  %v2519_v38 = vsel %vm2391_vm4, %v1488_v46, 0.0  ;;  %v3792_v39 = vunpack.i.h.bf16 %v4653_v40 }
 0x108   : > { %2788 = vadd.xlane.f32.xlu0 %v2653_v53  ;;  %v1013_v53 = vadd.f32 %v4617_v43, %v4561_v36  ;;  %v2720_v43 = vmul.f32 %v4582_v16, %v2585_v2  ;;  %v1260_v51 = vpop.f32.mrf.mxu1  ;;  %vm2394_vm5 = vcmp.eq.f32.partialorder %v3632_v50, %v4576_v47  ;;  %v3641_v20 = vunpack.i.l.bf16 %v4503_v23  ;;  %v4708_v50 = vpop.permute.xlu1 %3799 }
 0x109   : > { %v4649_v27 = vpop.f32.mrf.mxu0  ;;  %v2580_v34 = vsel %vm2452_vm3, %v1549_v4, 0.0  ;;  %vm2455_vm6 = vcmp.eq.f32.partialorder %v3786_v32, %v4576_v47  ;;  %v1494_v40 = vmax.f32 %v1026_v15, 0.0  ;;  %vm2458_vm7 = vcmp.eq.f32.partialorder %v3792_v39, %v4576_v47 }
 0x10a   : > { %v2715_v57 = vmul.f32 %v4582_v16, %v2580_v34  ;;  %v2583_v2 = vsel %vm2455_vm6, %v1552_v3, 0.0  ;;  %vm2397_vm8 = vcmp.eq.f32.partialorder %v3641_v20, %v4576_v47  ;;  %v3801_v15 = vunpack.i.l.bf16 %v4708_v50 }
 0x10b   : > { %v4656_v54 = vpop.f32.mrf.mxu0  ;;  %2910 = vadd.xlane.f32.xlu1 %v2714_v56  ;;  %v1491_v56 = vmax.f32 %v1013_v53, 0.0  ;;  %v1005_v53 = vadd.f32 %v4561_v36, %v4624_v48 }
 0x10c   : > { %2916 = vadd.xlane.f32.xlu0 %v2717_v18  ;;  %v1269_v18 = vadd.f32 %v3524_v24, %v4561_v36  ;;  %v3527_v24 = vpop.f32.mrf.mxu1  ;;  %vm2461_vm10 = vcmp.eq.f32.partialorder %v3801_v15, %v4576_v47 }
 0x10d   : > { %v4662_v0 = vpop.f32.mrf.mxu0  ;;  %v2522_v44 = vsel %vm2394_vm5, %v1491_v56, 0.0  ;;  %v2718_v56 = vmul.f32 %v4582_v16, %v2583_v2  ;;  %v1489_v34 = vmax.f32 %v1005_v53, 0.0 }
 0x10e   : > { %v1555_v4 = vmax.f32 %v1269_v18, 0.0  ;;  %v2657_v33 = vmul.f32 %v4582_v16, %v2522_v44  ;;  %v1282_v18 = vadd.f32 %v3527_v24, %v4561_v36  ;;  %v1273_v32 = vpop.f32.mrf.mxu1 }
 0x10f   : > { %v4669_v63 = vpop.f32.mrf.mxu0  ;;  %2794 = vadd.xlane.f32.xlu1 %v2656_v41 }
 0x110   : > { %2784 = vadd.xlane.f32.xlu0 %v2651_v22  ;;  %v2654_v22 = vmul.f32 %v4582_v16, %v2519_v38  ;;  %v1261_v38 = vadd.f32 %v4561_v36, %v1260_v51  ;;  %v1558_v24 = vmax.f32 %v1282_v18, 0.0  ;;  %v3787_v51 = vunpack.i.h.bf16 %v4679_v45  ;;  %v3528_v2 = vpop.f32.mrf.mxu1 }
 0x111   : > { %v4676_v5 = vpop.f32.mrf.mxu0  ;;  %v1029_v18 = vadd.f32 %v4643_v62, %v4561_v36  ;;  %v3642_v45 = vunpack.i.h.bf16 %v4503_v23  ;;  %v4741_v62 = vpop.permute.xlu0 %3794 }
 0x112   : > { %v1553_v53 = vmax.f32 %v1261_v38, 0.0  ;;  %vm2456_vm11 = vcmp.eq.f32.partialorder %v3787_v51, %v4576_v47  ;;  %v1276_v38 = vpop.f32.mrf.mxu1 }
 0x113   : > { %v4683_v52 = vpop.f32.mrf.mxu0  ;;  %2922 = vadd.xlane.f32.xlu1 %v2720_v43  ;;  %v3627_v43 = vunpack.i.h.bf16 %v4497_v8  ;;  %v1495_v15 = vmax.f32 %v1029_v18, 0.0  ;;  %vm2398_vm13 = vcmp.eq.f32.partialorder %v3642_v45, %v4576_v47 }
 0x114   : > { %2912 = vadd.xlane.f32.xlu0 %v2715_v57  ;;  %v2586_v57 = vsel %vm2458_vm7, %v1555_v4, 0.0 }
 0x115   : > { %v4690_v58 = vpop.f32.mrf.mxu0  ;;  %v2721_v3 = vmul.f32 %v4582_v16, %v2586_v57  ;;  %vm2392_vm9 = vcmp.eq.f32.partialorder %v3627_v43, %v4576_v47  ;;  %v2589_v43 = vsel %vm2461_vm10, %v1558_v24, 0.0  ;;  %v1285_v24 = vadd.f32 %v3528_v2, %v4561_v36 }
 0x116   : > { %v2520_v4 = vsel %vm2392_vm9, %v1489_v34, 0.0  ;;  %v2724_v34 = vmul.f32 %v4582_v16, %v2589_v43  ;;  %v1042_v2 = vadd.f32 %v4656_v54, %v4561_v36  ;;  %v2526_v43 = vsel %vm2398_vm13, %v1495_v15, 0.0 }
 0x117   : > { %v4696_v41 = vpop.f32.mrf.mxu0  ;;  %2790 = vadd.xlane.f32.xlu1 %v2654_v22  ;;  %v2525_v22 = vsel %vm2397_vm8, %v1494_v40, 0.0  ;;  %v2655_v20 = vmul.f32 %v4582_v16, %v2520_v4  ;;  %v3531_v4 = vpop.f32.mrf.mxu1  ;;  %v2661_v45 = vmul.f32 %v4582_v16, %v2526_v43  ;;  %v1277_v54 = vadd.f32 %v4561_v36, %v1276_v38 }
 0x118   : > { %2796 = vadd.xlane.f32.xlu0 %v2657_v33  ;;  %v2660_v39 = vmul.f32 %v4582_v16, %v2525_v22  ;;  %v1018_v33 = vadd.f32 %v4561_v36, %v4640_v1  ;;  %v1274_v1 = vadd.f32 %v4561_v36, %v1273_v32  ;;  %v2584_v22 = vsel %vm2456_vm11, %v1553_v53, 0.0 }
 0x119   : > { %v4704_v46 = vpop.f32.mrf.mxu0  ;;  %v2719_v23 = vmul.f32 %v4582_v16, %v2584_v22  ;;  %v3802_v32 = vunpack.i.h.bf16 %v4708_v50  ;;  %v3637_v50 = vunpack.i.h.bf16 %v4505_v49  ;;  %v3652_v43 = vunpack.i.h.bf16 %v4507_v7 }
 0x11a   : > { %v1492_v57 = vmax.f32 %v1018_v33, 0.0  ;;  %v1556_v51 = vmax.f32 %v1274_v1, 0.0  ;;  %v1289_v1 = vpop.f32.mrf.mxu1  ;;  %v3797_v38 = vunpack.i.h.bf16 %v4741_v62 }
 0x11b   : > { %v4711_v48 = vpop.f32.mrf.mxu0  ;;  %2918 = vadd.xlane.f32.xlu1 %v2718_v56  ;;  %v3636_v56 = vunpack.i.l.bf16 %v4505_v49  ;;  %vm2462_vm15 = vcmp.eq.f32.partialorder %v3802_v32, %v4576_v47  ;;  %vm2396_vm1 = vcmp.eq.f32.partialorder %v3637_v50, %v4576_v47  ;;  %v1290_v50 = vadd.f32 %v4561_v36, %v1289_v1 }
 0x11c   : > { %2924 = vadd.xlane.f32.xlu0 %v2721_v3  ;;  %vm2460_vm3 = vcmp.eq.f32.partialorder %v3797_v38, %v4576_v47  ;;  %vm2402_vm4 = vcmp.eq.f32.partialorder %v3652_v43, %v4576_v47 }
 0x11d   : > { %v4717_v8 = vpop.f32.mrf.mxu0  ;;  %vm2395_vm12 = vcmp.eq.f32.partialorder %v3636_v56, %v4576_v47  ;;  %v1021_v56 = vadd.f32 %v4561_v36, %v4649_v27 }
 0x11e   : > { %v2523_v33 = vsel %vm2395_vm12, %v1492_v57, 0.0  ;;  %v1498_v57 = vmax.f32 %v1042_v2, 0.0 }
 0x11f   : > { %v4721_v44 = vpop.f32.mrf.mxu0  ;;  %2802 = vadd.xlane.f32.xlu1 %v2660_v39  ;;  %v3796_v39 = vunpack.i.l.bf16 %v4741_v62  ;;  %v2658_v18 = vmul.f32 %v4582_v16, %v2523_v33  ;;  %v1298_v33 = vadd.f32 %v3531_v4, %v4561_v36  ;;  %v1045_v4 = vadd.f32 %v4669_v63, %v4561_v36 }
 0x120   : > { %2792 = vadd.xlane.f32.xlu0 %v2655_v20  ;;  %v1559_v20 = vmax.f32 %v1285_v24, 0.0  ;;  %v3810_v24 = vpop.permute.xlu1 %3809 }
 0x121   : > { %v4729_v40 = vpop.f32.mrf.mxu0  ;;  %vm2459_vm14 = vcmp.eq.f32.partialorder %v3796_v39, %v4576_v47  ;;  %v1034_v39 = vadd.f32 %v4561_v36, %v4662_v0  ;;  %v1562_v2 = vmax.f32 %v1298_v33, 0.0  ;;  %v1499_v63 = vmax.f32 %v1045_v4, 0.0 }
 0x122   : > { %v2587_v15 = vsel %vm2459_vm14, %v1556_v51, 0.0  ;;  %v2590_v27 = vsel %vm2462_vm15, %v1559_v20, 0.0  ;;  %v3811_v51 = vunpack.i.l.bf16 %v3810_v24  ;;  %v3812_v33 = vunpack.i.h.bf16 %v3810_v24 }
 0x123   : > { %v4739_v3 = vpop.f32.mrf.mxu0  ;;  %2930 = vadd.xlane.f32.xlu1 %v2724_v34  ;;  %v3651_v34 = vunpack.i.l.bf16 %v4507_v7  ;;  %v2722_v49 = vmul.f32 %v4582_v16, %v2587_v15  ;;  %v1557_v7 = vmax.f32 %v1277_v54, 0.0  ;;  %v3646_v15 = vunpack.i.l.bf16 %v4512_v21 }
 0x124   : > { %2920 = vadd.xlane.f32.xlu0 %v2719_v23  ;;  %v1493_v23 = vmax.f32 %v1021_v56, 0.0  ;;  %vm2465_vm2 = vcmp.eq.f32.partialorder %v3811_v51, %v4576_v47  ;;  %v2530_v43 = vsel %vm2402_vm4, %v1499_v63, 0.0  ;;  %v1037_v24 = vadd.f32 %v4561_v36, %v4676_v5 }
 0x125   : > { %v4749_v53 = vpop.f32.mrf.mxu0  ;;  %vm2401_vm0 = vcmp.eq.f32.partialorder %v3651_v34, %v4576_v47  ;;  %vm2399_vm5 = vcmp.eq.f32.partialorder %v3646_v15, %v4576_v47  ;;  %v4801_v15 = vpop.permute.xlu1 %3819  ;;  %vm2466_vm7 = vcmp.eq.f32.partialorder %v3812_v33, %v4576_v47 }
 0x126   : > { %v2529_v20 = vsel %vm2401_vm0, %v1498_v57, 0.0  ;;  %v2524_v56 = vsel %vm2396_vm1, %v1493_v23, 0.0  ;;  %v2593_v57 = vsel %vm2465_vm2, %v1562_v2, 0.0  ;;  %v2588_v23 = vsel %vm2460_vm3, %v1557_v7, 0.0 }
 0x127   : > { %2798 = vadd.xlane.f32.xlu1 %v2658_v18  ;;  %v4759_v22 = vpop.f32.mrf.mxu0  ;;  %v2725_v18 = vmul.f32 %v4582_v16, %v2590_v27  ;;  %v2664_v0 = vmul.f32 %v4582_v16, %v2529_v20  ;;  %v4779_v27 = vpop.permute.xlu0 %3804  ;;  %v2659_v34 = vmul.f32 %v4582_v16, %v2524_v56  ;;  %v1560_v20 = vmax.f32 %v1290_v50, 0.0 }
 0x128   : > { %2804 = vadd.xlane.f32.xlu0 %v2661_v45  ;;  %v3532_v45 = vpop.f32.mrf.mxu1  ;;  %v3806_v1 = vunpack.i.l.bf16 %v4779_v27  ;;  %v2723_v38 = vmul.f32 %v4582_v16, %v2588_v23  ;;  %v3647_v7 = vunpack.i.h.bf16 %v4512_v21  ;;  %v3661_v56 = vunpack.i.l.bf16 %v4514_v6 }
 0x129   : > { %v4770_v32 = vpop.f32.mrf.mxu0  ;;  %v1301_v54 = vadd.f32 %v3532_v45, %v4561_v36  ;;  %v1058_v45 = vadd.f32 %v4683_v52, %v4561_v36  ;;  %v2665_v21 = vmul.f32 %v4582_v16, %v2530_v43  ;;  %v1497_v23 = vmax.f32 %v1037_v24, 0.0 }
 0x12a   : > { %v1292_v62 = vpop.f32.mrf.mxu1  ;;  %vm2463_vm6 = vcmp.eq.f32.partialorder %v3806_v1, %v4576_v47  ;;  %vm2400_vm8 = vcmp.eq.f32.partialorder %v3647_v7, %v4576_v47  ;;  %v3807_v33 = vunpack.i.h.bf16 %v4779_v27  ;;  %v3821_v1 = vunpack.i.l.bf16 %v4801_v15 }
 0x12b   : > { %2926 = vadd.xlane.f32.xlu1 %v2722_v49  ;;  %v1496_v49 = vmax.f32 %v1034_v39, 0.0  ;;  %v2728_v39 = vmul.f32 %v4582_v16, %v2593_v57  ;;  %v1563_v2 = vmax.f32 %v1301_v54, 0.0  ;;  %v1502_v50 = vmax.f32 %v1058_v45, 0.0  ;;  %v4810_v54 = vpop.permute.xlu0 %3814 }
 0x12c   : > { %2932 = vadd.xlane.f32.xlu0 %v2725_v18  ;;  %v4783_v18 = vpop.f32.mrf.mxu0  ;;  %vm2405_vm9 = vcmp.eq.f32.partialorder %v3661_v56, %v4576_v47  ;;  %v1061_v27 = vadd.f32 %v4696_v41, %v4561_v36  ;;  %v3662_v7 = vunpack.i.h.bf16 %v4514_v6  ;;  %v3656_v56 = vunpack.i.l.bf16 %v4516_v10 }
 0x12d   : > { %v2527_v4 = vsel %vm2399_vm5, %v1496_v49, 0.0  ;;  %v2594_v57 = vsel %vm2466_vm7, %v1563_v2, 0.0  ;;  %v2528_v2 = vsel %vm2400_vm8, %v1497_v23, 0.0  ;;  %vm2464_vm10 = vcmp.eq.f32.partialorder %v3807_v33, %v4576_v47 }
 0x12e   : > { %v4794_v51 = vpop.f32.mrf.mxu0  ;;  %v2662_v52 = vmul.f32 %v4582_v16, %v2527_v4  ;;  %v2533_v4 = vsel %vm2405_vm9, %v1502_v50, 0.0  ;;  %vm2469_vm11 = vcmp.eq.f32.partialorder %v3821_v1, %v4576_v47  ;;  %v2663_v6 = vmul.f32 %v4582_v16, %v2528_v2 }
 0x12f   : > { %2810 = vadd.xlane.f32.xlu1 %v2664_v0  ;;  %v3535_v0 = vpop.f32.mrf.mxu1  ;;  %vm2406_vm12 = vcmp.eq.f32.partialorder %v3662_v7, %v4576_v47  ;;  %v3822_v33 = vunpack.i.h.bf16 %v4801_v15  ;;  %v3816_v1 = vunpack.i.l.bf16 %v4810_v54  ;;  %vm2403_vm13 = vcmp.eq.f32.partialorder %v3656_v56, %v4576_v47 }
 0x130   : > { %2800 = vadd.xlane.f32.xlu0 %v2659_v34  ;;  %v2591_v34 = vsel %vm2463_vm6, %v1560_v20, 0.0  ;;  %v1314_v49 = vadd.f32 %v3535_v0, %v4561_v36  ;;  %v4807_v5 = vpop.f32.mrf.mxu0  ;;  %v1050_v0 = vadd.f32 %v4561_v36, %v4690_v58  ;;  %v2668_v58 = vmul.f32 %v4582_v16, %v2533_v4 }
 0x131   : > { %v1305_v63 = vpop.f32.mrf.mxu1  ;;  %v2726_v20 = vmul.f32 %v4582_v16, %v2591_v34  ;;  %v4829_v34 = vpop.permute.xlu0 %3824  ;;  %v1053_v56 = vadd.f32 %v4561_v36, %v4704_v46  ;;  %vm2467_vm14 = vcmp.eq.f32.partialorder %v3816_v1, %v4576_v47  ;;  %vm2470_vm15 = vcmp.eq.f32.partialorder %v3822_v33, %v4576_v47 }
 0x132   : > { %v1566_v45 = vmax.f32 %v1314_v49, 0.0  ;;  %v4820_v43 = vpop.f32.mrf.mxu0  ;;  %v1500_v49 = vmax.f32 %v1050_v0, 0.0  ;;  %v1306_v41 = vadd.f32 %v4561_v36, %v1305_v63  ;;  %v1074_v0 = vadd.f32 %v4711_v48, %v4561_v36 }
 0x133   : > { %2938 = vadd.xlane.f32.xlu1 %v2728_v39  ;;  %v1293_v39 = vadd.f32 %v4561_v36, %v1292_v62  ;;  %v2729_v62 = vmul.f32 %v4582_v16, %v2594_v57  ;;  %v3671_v48 = vunpack.i.l.bf16 %v4518_v42  ;;  %v3817_v33 = vunpack.i.h.bf16 %v4810_v54 }
 0x134   : > { %2928 = vadd.xlane.f32.xlu0 %v2723_v38  ;;  %v3536_v38 = vpop.f32.mrf.mxu1  ;;  %v2597_v50 = vsel %vm2469_vm11, %v1566_v45, 0.0  ;;  %v4835_v57 = vpop.f32.mrf.mxu0  ;;  %v2531_v4 = vsel %vm2403_vm13, %v1500_v49, 0.0  ;;  %v1564_v45 = vmax.f32 %v1306_v41, 0.0  ;;  %v1506_v41 = vmax.f32 %v1074_v0, 0.0 }
 0x135   : > { %v1561_v24 = vmax.f32 %v1293_v39, 0.0  ;;  %v1503_v39 = vmax.f32 %v1061_v27, 0.0  ;;  %v2732_v63 = vmul.f32 %v4582_v16, %v2597_v50  ;;  %v4851_v27 = vpop.permute.xlu0 %3834  ;;  %v2666_v50 = vmul.f32 %v4582_v16, %v2531_v4 }
 0x136   : > { %v4846_v2 = vpop.f32.mrf.mxu0  ;;  %v2595_v49 = vsel %vm2467_vm14, %v1564_v45, 0.0  ;;  %vm2409_vm1 = vcmp.eq.f32.partialorder %v3671_v48, %v4576_v47  ;;  %v3672_v48 = vunpack.i.h.bf16 %v4518_v42  ;;  %vm2468_vm2 = vcmp.eq.f32.partialorder %v3817_v33, %v4576_v47 }
 0x137   : > { %2806 = vadd.xlane.f32.xlu1 %v2662_v52  ;;  %v4827_v52 = vpop.permute.xlu1 %3829  ;;  %v2592_v23 = vsel %vm2464_vm10, %v1561_v24, 0.0  ;;  %v2534_v15 = vsel %vm2406_vm12, %v1503_v39, 0.0  ;;  %v2730_v0 = vmul.f32 %v4582_v16, %v2595_v49  ;;  %v3666_v49 = vunpack.i.l.bf16 %v4520_v14 }
 0x138   : > { %2812 = vadd.xlane.f32.xlu0 %v2665_v21  ;;  %v1308_v21 = vpop.f32.mrf.mxu1  ;;  %v4861_v39 = vpop.f32.mrf.mxu0  ;;  %v2669_v46 = vmul.f32 %v4582_v16, %v2534_v15  ;;  %v3831_v1 = vunpack.i.l.bf16 %v4827_v52  ;;  %vm2410_vm4 = vcmp.eq.f32.partialorder %v3672_v48, %v4576_v47 }
 0x139   : > { %v4870_v45 = vpop.permute.xlu0 %3844  ;;  %vm2407_vm5 = vcmp.eq.f32.partialorder %v3666_v49, %v4576_v47  ;;  %v3667_v49 = vunpack.i.h.bf16 %v4520_v14 }
 0x13a   : > { %vm2473_vm3 = vcmp.eq.f32.partialorder %v3831_v1, %v4576_v47  ;;  %v3832_v1 = vunpack.i.h.bf16 %v4827_v52  ;;  %v1069_v52 = vadd.f32 %v4561_v36, %v4729_v40 }
 0x13b   : > { %2934 = vadd.xlane.f32.xlu1 %v2726_v20  ;;  %v1317_v20 = vadd.f32 %v3536_v38, %v4561_v36  ;;  %v2727_v38 = vmul.f32 %v4582_v16, %v2592_v23  ;;  %v4849_v24 = vpop.permute.xlu1 %3839  ;;  %vm2408_vm8 = vcmp.eq.f32.partialorder %v3667_v49, %v4576_v47 }
 0x13c   : > { %2940 = vadd.xlane.f32.xlu0 %v2729_v62  ;;  %v3539_v62 = vpop.f32.mrf.mxu1  ;;  %vm2474_vm7 = vcmp.eq.f32.partialorder %v3832_v1, %v4576_v47  ;;  %v3827_v1 = vunpack.i.h.bf16 %v4829_v34 }
 0x13d   : > { %v1567_v7 = vmax.f32 %v1317_v20, 0.0  ;;  %v4892_v42 = vpop.permute.xlu0 %3854 }
 0x13e   : > { %v1321_v23 = vpop.f32.mrf.mxu1  ;;  %vm2472_vm10 = vcmp.eq.f32.partialorder %v3827_v1, %v4576_v47  ;;  %v3842_v1 = vunpack.i.h.bf16 %v4849_v24 }
 0x13f   : > { %2818 = vadd.xlane.f32.xlu1 %v2668_v58  ;;  %v3657_v58 = vunpack.i.h.bf16 %v4516_v10  ;;  %v2598_v20 = vsel %vm2470_vm15, %v1567_v7, 0.0  ;;  %v1501_v10 = vmax.f32 %v1053_v56, 0.0  ;;  %v4868_v4 = vpop.permute.xlu1 %3849  ;;  %v4876_v7 = vpop.f32.mrf.mxu0 }
 0x140   : > { %2808 = vadd.xlane.f32.xlu0 %v2663_v6  ;;  %v1330_v6 = vadd.f32 %v3539_v62, %v4561_v36  ;;  %v2537_v62 = vsel %vm2409_vm1, %v1506_v41, 0.0  ;;  %v3540_v15 = vpop.f32.mrf.mxu1  ;;  %v2733_v54 = vmul.f32 %v4582_v16, %v2598_v20 }
 0x141   : > { %vm2404_vm0 = vcmp.eq.f32.partialorder %v3657_v58, %v4576_v47  ;;  %v1333_v33 = vadd.f32 %v3540_v15, %v4561_v36 }
 0x142   : > { %v2532_v56 = vsel %vm2404_vm0, %v1501_v10, 0.0  ;;  %v1324_v20 = vpop.f32.mrf.mxu1  ;;  %v4887_v10 = vpop.f32.mrf.mxu0 }
 0x143   : > { %2946 = vadd.xlane.f32.xlu1 %v2732_v63  ;;  %v1309_v63 = vadd.f32 %v4561_v36, %v1308_v21  ;;  %v1066_v21 = vadd.f32 %v4561_v36, %v4717_v8  ;;  %v2672_v8 = vmul.f32 %v4582_v16, %v2537_v62 }
 0x144   : > { %2936 = vadd.xlane.f32.xlu0 %v2727_v38  ;;  %v1570_v38 = vmax.f32 %v1330_v6, 0.0 }
 0x145   : > { %v1565_v58 = vmax.f32 %v1309_v63, 0.0  ;;  %v1504_v6 = vmax.f32 %v1066_v21, 0.0  ;;  %v4890_v63 = vpop.permute.xlu1 %3859 }
 0x146   : > { %v2601_v41 = vsel %vm2473_vm3, %v1570_v38, 0.0 }
 0x147   : > { %2814 = vadd.xlane.f32.xlu1 %v2666_v50  ;;  %v1077_v50 = vadd.f32 %v4721_v44, %v4561_v36  ;;  %v2667_v44 = vmul.f32 %v4582_v16, %v2532_v56  ;;  %v2736_v62 = vmul.f32 %v4582_v16, %v2601_v41  ;;  %v2535_v38 = vsel %vm2407_vm5, %v1504_v6, 0.0 }
 0x148   : > { %2820 = vadd.xlane.f32.xlu0 %v2669_v46  ;;  %v1322_v46 = vadd.f32 %v4561_v36, %v1321_v23  ;;  %v3826_v23 = vunpack.i.l.bf16 %v4829_v34  ;;  %v1090_v56 = vadd.f32 %v4739_v3, %v4561_v36  ;;  %v3681_v41 = vunpack.i.l.bf16 %v4522_v11 }
 0x149   : > { %v4909_v6 = vpop.permute.xlu1 %3869  ;;  %v2670_v3 = vmul.f32 %v4582_v16, %v2535_v38 }
 0x14a   : > { %v1568_v21 = vmax.f32 %v1322_v46, 0.0  ;;  %5662 = vst [vmem:[#allocation2_spill] sm:$0xff] %v4909_v6  ;;  %v4911_v46 = vpop.permute.xlu0 %3864  ;;  %vm2471_vm6 = vcmp.eq.f32.partialorder %v3826_v23, %v4576_v47  ;;  %v1325_v6 = vadd.f32 %v4561_v36, %v1324_v20  ;;  %v3841_v23 = vunpack.i.l.bf16 %v4849_v24 }
 0x14b   : > { %2942 = vadd.xlane.f32.xlu1 %v2730_v0  ;;  %v2596_v0 = vsel %vm2468_vm2, %v1565_v58, 0.0  ;;  %v3543_v58 = vpop.f32.mrf.mxu1  ;;  %vm2413_vm9 = vcmp.eq.f32.partialorder %v3681_v41, %v4576_v47  ;;  %v1093_v41 = vadd.f32 %v4759_v22, %v4561_v36 }
 0x14c   : > { %2948 = vadd.xlane.f32.xlu0 %v2733_v54  ;;  %v1507_v54 = vmax.f32 %v1077_v50, 0.0  ;;  %v4902_v50 = vpop.f32.mrf.mxu0  ;;  %v2731_v15 = vmul.f32 %v4582_v16, %v2596_v0  ;;  %v1510_v0 = vmax.f32 %v1090_v56, 0.0  ;;  %v1346_v40 = vadd.f32 %v3543_v58, %v4561_v36 }
 0x14d   : > { %v1082_v58 = vadd.f32 %v4561_v36, %v4749_v53  ;;  %v3676_v53 = vunpack.i.l.bf16 %v4524_v12  ;;  %vm2477_vm11 = vcmp.eq.f32.partialorder %v3841_v23, %v4576_v47  ;;  %v3836_v23 = vunpack.i.l.bf16 %v4851_v27 }
 0x14e   : > { %v2538_v48 = vsel %vm2410_vm4, %v1507_v54, 0.0  ;;  %v1337_v54 = vpop.f32.mrf.mxu1  ;;  %v1574_v56 = vmax.f32 %v1346_v40, 0.0  ;;  %v4933_v49 = vpop.permute.xlu0 %3874 }
 0x14f   : > { %2826 = vadd.xlane.f32.xlu1 %v2672_v8  ;;  %v1571_v8 = vmax.f32 %v1333_v33, 0.0  ;;  %v4917_v33 = vpop.f32.mrf.mxu0  ;;  %v2673_v14 = vmul.f32 %v4582_v16, %v2538_v48  ;;  %vm2411_vm13 = vcmp.eq.f32.partialorder %v3676_v53, %v4576_v47  ;;  %v3677_v53 = vunpack.i.h.bf16 %v4524_v12 }
 0x150   : > { %2816 = vadd.xlane.f32.xlu0 %v2667_v44  ;;  %v2599_v44 = vsel %vm2471_vm6, %v1568_v21, 0.0  ;;  %v2541_v21 = vsel %vm2413_vm9, %v1510_v0, 0.0  ;;  %v3544_v48 = vpop.f32.mrf.mxu1  ;;  %v2605_v40 = vsel %vm2477_vm11, %v1574_v56, 0.0 }
 0x151   : > { %v2734_v38 = vmul.f32 %v4582_v16, %v2599_v44  ;;  %v3682_v44 = vunpack.i.h.bf16 %v4522_v11  ;;  %v2676_v0 = vmul.f32 %v4582_v16, %v2541_v21  ;;  %v1511_v11 = vmax.f32 %v1093_v41, 0.0 }
 0x152   : > { %v2740_v56 = vmul.f32 %v4582_v16, %v2605_v40  ;;  %v3691_v40 = vunpack.i.l.bf16 %v4526_v26 }
 0x153   : > { %2954 = vadd.xlane.f32.xlu1 %v2736_v62  ;;  %v2602_v62 = vsel %vm2474_vm7, %v1571_v8, 0.0  ;;  %v4928_v8 = vpop.f32.mrf.mxu0  ;;  %vm2414_vm12 = vcmp.eq.f32.partialorder %v3682_v44, %v4576_v47 }
 0x154   : > { %2944 = vadd.xlane.f32.xlu0 %v2731_v15  ;;  %v1505_v15 = vmax.f32 %v1069_v52, 0.0  ;;  %v2737_v20 = vmul.f32 %v4582_v16, %v2602_v62  ;;  %v4931_v52 = vpop.permute.xlu1 %3879  ;;  %v1338_v62 = vadd.f32 %v4561_v36, %v1337_v54  ;;  %v4952_v54 = vpop.permute.xlu0 %3884  ;;  %v2542_v44 = vsel %vm2414_vm12, %v1511_v11, 0.0 }
 0x156   : > { %v2536_v34 = vsel %vm2408_vm8, %v1505_v15, 0.0  ;;  %v4943_v15 = vpop.f32.mrf.mxu0  ;;  %vm3030_vm8 = vcmask 7168  }
 0x157   : > { %2822 = vadd.xlane.f32.xlu1 %v2670_v3  ;;  %v1569_v3 = vmax.f32 %v1325_v6, 0.0  ;;  %v1340_v6 = vpop.f32.mrf.mxu1  ;;  %v2671_v22 = vmul.f32 %v4582_v16, %v2536_v34  ;;  %v1572_v34 = vmax.f32 %v1338_v62, 0.0 }
 0x158   : > { %2828 = vadd.xlane.f32.xlu0 %v2673_v14  ;;  %v1508_v14 = vmax.f32 %v1082_v58, 0.0  ;;  %v4950_v21 = vpop.permute.xlu1 %3889 }
 0x15a   : > { %v2539_v58 = vsel %vm2411_vm13, %v1508_v14, 0.0 }
 0x15b   : > { %2950 = vadd.xlane.f32.xlu1 %v2734_v38  ;;  %v2600_v38 = vsel %vm2472_vm10, %v1569_v3, 0.0  ;;  %v4963_v3 = vpop.f32.mrf.mxu0 }
 0x15c   : > { %2956 = vadd.xlane.f32.xlu0 %v2737_v20  ;;  %v1349_v20 = vadd.f32 %v3544_v48, %v4561_v36  ;;  %v4959_v36 = vld [vmem:[%s5656_s3] ss:$0 sm:$0xff]  ;;  %v3547_v48 = vpop.f32.mrf.mxu1  ;;  %v2735_v41 = vmul.f32 %v4582_v16, %v2600_v38 }
 0x15d   : > { %v1106_v24 = vadd.f32 %v4959_v36, %v4783_v18  ;;  %v1085_v47 = vadd.f32 %v4959_v36, %v4770_v32  ;;  %v4973_v18 = vld [vmem:[%s5654_s1] ss:$0 sm:$0xff]  ;;  %v1362_v62 = vadd.f32 %v4959_v36, %v3547_v48  ;;  %v4984_v38 = vpop.f32.mrf.mxu0 }
 0x15e   : > { %vm2475_vm14 = vcmp.eq.f32.partialorder %v3836_v23, %v4973_v18  ;;  %vm2478_vm15 = vcmp.eq.f32.partialorder %v3842_v1, %v4973_v18  ;;  %v4980_v16 = vld [vmem:[%s5657_s4] ss:$0 sm:$0xff]  ;;  %v4989_v23 = vpop.permute.xlu0 %3894  ;;  %vm2412_vm0 = vcmp.eq.f32.partialorder %v3677_v53, %v4973_v18  ;;  %vm2417_vm1 = vcmp.eq.f32.partialorder %v3691_v40, %v4973_v18 }
 0x15f   : > { %2834 = vadd.xlane.f32.xlu1 %v2676_v0  ;;  %v1575_v0 = vmax.f32 %v1349_v20, 0.0  ;;  %v2674_v32 = vmul.f32 %v4980_v16, %v2539_v58  ;;  %v2603_v12 = vsel %vm2475_vm14, %v1572_v34, 0.0  ;;  %v1514_v14 = vmax.f32 %v1106_v24, 0.0  ;;  %v4987_v20 = vpop.permute.xlu1 %3899 }
 0x160   : > { %2824 = vadd.xlane.f32.xlu0 %v2671_v22  ;;  %v1353_v22 = vpop.f32.mrf.mxu1  ;;  %v2677_v11 = vmul.f32 %v4980_v16, %v2542_v44  ;;  %5663 = vst [vmem:[#allocation3_spill] sm:$0xff] %v4987_v20  ;;  %v3837_v58 = vunpack.i.h.bf16 %v4851_v27  ;;  %v3851_v34 = vunpack.i.l.bf16 %v4868_v4  ;;  %v2738_v24 = vmul.f32 %v4980_v16, %v2603_v12  ;;  %v4999_v20 = vpop.f32.mrf.mxu0 }
 0x161   : > { %v2606_v1 = vsel %vm2478_vm15, %v1575_v0, 0.0  ;;  %v2545_v48 = vsel %vm2417_vm1, %v1514_v14, 0.0  ;;  %v1578_v44 = vmax.f32 %v1362_v62, 0.0  ;;  %v1098_v0 = vadd.f32 %v4959_v36, %v4794_v51 }
 0x162   : > { %v1109_v27 = vadd.f32 %v4959_v36, %v4807_v5  ;;  %v3692_v40 = vunpack.i.h.bf16 %v4526_v26  ;;  %v3686_v12 = vunpack.i.l.bf16 %v4528_v61  ;;  %v5008_v62 = vpop.permute.xlu0 %3904  ;;  %vm2476_vm2 = vcmp.eq.f32.partialorder %v3837_v58, %v4973_v18 }
 0x163   : > { %2962 = vadd.xlane.f32.xlu1 %v2740_v56  ;;  %v1509_v56 = vmax.f32 %v1085_v47, 0.0  ;;  %v3548_v47 = vpop.f32.mrf.mxu1  ;;  %v5006_v14 = vpop.permute.xlu1 %3909  ;;  %vm2481_vm3 = vcmp.eq.f32.partialorder %v3851_v34, %v4973_v18  ;;  %v2680_v51 = vmul.f32 %v4980_v16, %v2545_v48  ;;  %v1354_v5 = vadd.f32 %v4959_v36, %v1353_v22 }
 0x164   : > { %2952 = vadd.xlane.f32.xlu0 %v2735_v41  ;;  %v1341_v41 = vadd.f32 %v4959_v36, %v1340_v6  ;;  %v2741_v6 = vmul.f32 %v4980_v16, %v2606_v1  ;;  %5664 = vst [vmem:[#allocation4_spill] sm:$0xff] %v5006_v14  ;;  %v1512_v1 = vmax.f32 %v1098_v0, 0.0  ;;  %v1365_v14 = vadd.f32 %v4959_v36, %v3548_v47 }
 0x165   : > { %v2540_v53 = vsel %vm2412_vm0, %v1509_v56, 0.0  ;;  %v1356_v56 = vpop.f32.mrf.mxu1  ;;  %vm2418_vm4 = vcmp.eq.f32.partialorder %v3692_v40, %v4973_v18  ;;  %v3852_v58 = vunpack.i.h.bf16 %v4868_v4  ;;  %v3846_v34 = vunpack.i.l.bf16 %v4870_v45 }
 0x166   : > { %v2675_v26 = vmul.f32 %v4980_v16, %v2540_v53  ;;  %vm2415_vm5 = vcmp.eq.f32.partialorder %v3686_v12, %v4973_v18  ;;  %v1122_v0 = vadd.f32 %v4959_v36, %v4835_v57  ;;  %v5033_v4 = vpop.permute.xlu0 %3914  ;;  %v1579_v12 = vmax.f32 %v1365_v14, 0.0 }
 0x167   : > { %2830 = vadd.xlane.f32.xlu1 %v2674_v32  ;;  %v1573_v32 = vmax.f32 %v1341_v41, 0.0  ;;  %v5014_v41 = vpop.f32.mrf.mxu0  ;;  %v2543_v48 = vsel %vm2415_vm5, %v1512_v1, 0.0  ;;  %v5025_v53 = vpop.f32.mrf.mxu1  ;;  %v3701_v57 = vunpack.i.l.bf16 %v4530_v9  ;;  %vm2479_vm6 = vcmp.eq.f32.partialorder %v3846_v34, %v4973_v18 }
 0x168   : > { %2836 = vadd.xlane.f32.xlu0 %v2677_v11  ;;  %v2609_v11 = vsel %vm2481_vm3, %v1578_v44, 0.0  ;;  %v1576_v44 = vmax.f32 %v1354_v5, 0.0  ;;  %vm2482_vm7 = vcmp.eq.f32.partialorder %v3852_v58, %v4973_v18  ;;  %v2678_v1 = vmul.f32 %v4980_v16, %v2543_v48 }
 0x169   : > { %v2744_v22 = vmul.f32 %v4980_v16, %v2609_v11  ;;  %v5027_v47 = vpop.f32.mrf.mxu0  ;;  %v3687_v11 = vunpack.i.h.bf16 %v4528_v61  ;;  %v1518_v14 = vmax.f32 %v1122_v0, 0.0  ;;  %v1114_v61 = vadd.f32 %v4959_v36, %v4846_v2  ;;  %v5049_v5 = vpop.f32.mrf.mxu1 }
 0x16a   : > { %v1357_v34 = vadd.f32 %v4959_v36, %v1356_v56  ;;  %v3696_v2 = vunpack.i.l.bf16 %v4532_v60  ;;  %vm2421_vm10 = vcmp.eq.f32.partialorder %v3701_v57, %v4973_v18 }
 0x16b   : > { %2958 = vadd.xlane.f32.xlu1 %v2738_v24  ;;  %v2604_v24 = vsel %vm2476_vm2, %v1573_v32, 0.0  ;;  %vm2416_vm9 = vcmp.eq.f32.partialorder %v3687_v11, %v4973_v18  ;;  %v2549_v56 = vsel %vm2421_vm10, %v1518_v14, 0.0  ;;  %v3702_v14 = vunpack.i.h.bf16 %v4530_v9 }
 0x16c   : > { %2964 = vadd.xlane.f32.xlu0 %v2741_v6  ;;  %v1515_v6 = vmax.f32 %v1109_v27, 0.0  ;;  %v2739_v32 = vmul.f32 %v4980_v16, %v2604_v24  ;;  %v5031_v27 = vpop.permute.xlu1 %3919  ;;  %vm2419_vm12 = vcmp.eq.f32.partialorder %v3696_v2, %v4973_v18  ;;  %v1130_v9 = vadd.f32 %v4959_v36, %v4902_v50 }
 0x16d   : > { %v1117_v2 = vadd.f32 %v4959_v36, %v4876_v7  ;;  %v3706_v50 = vunpack.i.l.bf16 %v4536_v19  ;;  %vm2422_vm13 = vcmp.eq.f32.partialorder %v3702_v14, %v4973_v18  ;;  %v1141_v14 = vadd.f32 %v4959_v36, %v4917_v33 }
 0x16e   : > { %v2546_v40 = vsel %vm2418_vm4, %v1515_v6, 0.0  ;;  %v2610_v6 = vsel %vm2482_vm7, %v1579_v12, 0.0  ;;  %v1138_v12 = vadd.f32 %v4959_v36, %v4887_v10  ;;  %v3711_v10 = vunpack.i.l.bf16 %v4534_v13 }
 0x16f   : > { %2842 = vadd.xlane.f32.xlu1 %v2680_v51  ;;  %v1101_v51 = vadd.f32 %v4959_v36, %v4820_v43  ;;  %v2607_v43 = vsel %vm2479_vm6, %v1576_v44, 0.0  ;;  %v2681_v24 = vmul.f32 %v4980_v16, %v2546_v40  ;;  %v3847_v44 = vunpack.i.h.bf16 %v4870_v45  ;;  %v5064_v40 = vpop.f32.mrf.mxu1 }
 0x170   : > { %2832 = vadd.xlane.f32.xlu0 %v2675_v26  ;;  %v5051_v26 = vpop.f32.mrf.mxu0  ;;  %v2742_v0 = vmul.f32 %v4980_v16, %v2607_v43  ;;  %v2745_v11 = vmul.f32 %v4980_v16, %v2610_v6  ;;  %v1125_v45 = vadd.f32 %v4959_v36, %v4861_v39  ;;  %vm2425_vm14 = vcmp.eq.f32.partialorder %v3711_v10, %v4973_v18 }
 0x171   : > { %v1513_v58 = vmax.f32 %v1101_v51, 0.0  ;;  %vm2480_vm11 = vcmp.eq.f32.partialorder %v3847_v44, %v4973_v18  ;;  %v5082_v6 = vpop.f32.mrf.mxu1  ;;  %vm2423_vm0 = vcmp.eq.f32.partialorder %v3706_v50, %v4973_v18 }
 0x172   : > { %v5068_v51 = vpop.f32.mrf.mxu0 }
 0x173   : > { %2970 = vadd.xlane.f32.xlu1 %v2744_v22 }
 0x174   : > { %2960 = vadd.xlane.f32.xlu0 %v2739_v32  ;;  %v1516_v32 = vmax.f32 %v1114_v61, 0.0  ;;  %v2684_v61 = vmul.f32 %v4980_v16, %v2549_v56 }
 0x176   : > { %v2547_v39 = vsel %vm2419_vm12, %v1516_v32, 0.0  ;;  %v3697_v32 = vunpack.i.h.bf16 %v4532_v60  ;;  %v1154_v60 = vadd.f32 %v4959_v36, %v4943_v15  ;;  %v3712_v15 = vunpack.i.h.bf16 %v4534_v13 }
 0x177   : > { %2838 = vadd.xlane.f32.xlu1 %v2678_v1  ;;  %v2544_v1 = vsel %vm2416_vm9, %v1513_v58, 0.0  ;;  %v1522_v58 = vmax.f32 %v1138_v12, 0.0  ;;  %v2682_v12 = vmul.f32 %v4980_v16, %v2547_v39  ;;  %v3721_v39 = vunpack.i.l.bf16 %v4538_v35 }
 0x178   : > { %2844 = vadd.xlane.f32.xlu0 %v2681_v24  ;;  %v1577_v24 = vmax.f32 %v1357_v34, 0.0  ;;  %v5086_v34 = vpop.f32.mrf.mxu0  ;;  %vm2420_vm15 = vcmp.eq.f32.partialorder %v3697_v32, %v4973_v18  ;;  %vm2426_vm1 = vcmp.eq.f32.partialorder %v3712_v15, %v4973_v18 }
 0x179   : > { %v2553_v7 = vsel %vm2425_vm14, %v1522_v58, 0.0  ;;  %vm2429_vm2 = vcmp.eq.f32.partialorder %v3721_v39, %v4973_v18  ;;  %v3731_v39 = vunpack.i.l.bf16 %v4542_v17 }
 0x17a   : > { %v2688_v58 = vmul.f32 %v4980_v16, %v2553_v7 }
 0x17b   : > { %2966 = vadd.xlane.f32.xlu1 %v2742_v0  ;;  %v1519_v0 = vmax.f32 %v1125_v45, 0.0  ;;  %vm2433_vm6 = vcmp.eq.f32.partialorder %v3731_v39, %v4973_v18 }
 0x17c   : > { %v2907_v22 = vpop.xlane.xlu1 %2906  ;;  %2972 = vadd.xlane.f32.xlu0 %v2745_v11  ;;  %v5100_v11 = vpop.f32.mrf.mxu1 }
 0x17d   : > { %v2779_v48 = vpop.xlane.xlu0 %2778  ;;  %3097 = vst.msk [vmem:[%s5045_s30 + $0x210] sm:$0xff] %vm3030_vm8, %v2907_v22  ;;  %v2679_v22 = vmul.f32 %v4980_v16, %v2544_v1  ;;  %v1520_v1 = vmax.f32 %v1130_v9, 0.0 }
 0x17e   : > { %3033 = vst.msk [vmem:[%s5045_s30 + $0x10] sm:$0xff] %vm3030_vm8, %v2779_v48  ;;  %v2608_v48 = vsel %vm2480_vm11, %v1577_v24, 0.0  ;;  %v5104_v24 = vpop.f32.mrf.mxu0  ;;  %v5118_v9 = vpop.f32.mrf.mxu1 }
 0x17f   : > { %2850 = vadd.xlane.f32.xlu1 %v2684_v61  ;;  %v2743_v45 = vmul.f32 %v4980_v16, %v2608_v48  ;;  %v2551_v33 = vsel %vm2423_vm0, %v1520_v1, 0.0  ;;  %v1146_v48 = vadd.f32 %v4959_v36, %v4963_v3  ;;  %v3716_v3 = vunpack.i.l.bf16 %v4540_v31 }
 0x180   : > { %v2903_v57 = vpop.xlane.xlu1 %2902  ;;  %2840 = vadd.xlane.f32.xlu0 %v2679_v22  ;;  %v1526_v22 = vmax.f32 %v1154_v60, 0.0  ;;  %v2686_v7 = vmul.f32 %v4980_v16, %v2551_v33 }
 0x181   : > { %v2775_v43 = vpop.xlane.xlu0 %2774  ;;  %3095 = vst.msk [vmem:[%s5045_s30 + $0x200] sm:$0xff] %vm3030_vm8, %v2903_v57  ;;  %v2550_v57 = vsel %vm2422_vm13, %v1519_v0, 0.0  ;;  %v5122_v0 = vpop.f32.mrf.mxu0  ;;  %v1524_v60 = vmax.f32 %v1146_v48, 0.0  ;;  %vm2427_vm4 = vcmp.eq.f32.partialorder %v3716_v3, %v4973_v18  ;;  %v1162_v48 = vadd.f32 %v4959_v36, %v5027_v47 }
 0x182   : > { %3031 = vst.msk [vmem:[%s5045_s30] sm:$0xff] %vm3030_vm8, %v2775_v43  ;;  %v1517_v43 = vmax.f32 %v1117_v2, 0.0  ;;  %v2685_v2 = vmul.f32 %v4980_v16, %v2550_v57  ;;  %v2557_v1 = vsel %vm2429_vm2, %v1526_v22, 0.0  ;;  %v3726_v47 = vunpack.i.l.bf16 %v4544_v37 }
 0x183   : > { %2846 = vadd.xlane.f32.xlu1 %v2682_v12  ;;  %v3707_v12 = vunpack.i.h.bf16 %v4536_v19  ;;  %v1170_v19 = vadd.f32 %v4959_v36, %v5014_v41  ;;  %v3722_v41 = vunpack.i.h.bf16 %v4538_v35  ;;  %v2555_v33 = vsel %vm2427_vm4, %v1524_v60, 0.0 }
 0x184   : > { %v2777_v44 = vpop.xlane.xlu1 %2776  ;;  %2968 = vadd.xlane.f32.xlu0 %v2743_v45  ;;  %v2548_v13 = vsel %vm2420_vm15, %v1517_v43, 0.0  ;;  %v5140_v45 = vpop.f32.mrf.mxu0  ;;  %v2690_v3 = vmul.f32 %v4980_v16, %v2555_v33  ;;  %vm2431_vm9 = vcmp.eq.f32.partialorder %v3726_v47, %v4973_v18  ;;  %v1178_v33 = vadd.f32 %v4959_v36, %v5104_v24 }
 0x185   : > { %v2781_v56 = vpop.xlane.xlu0 %2780  ;;  %3032 = vst.msk [vmem:[%s5045_s30 + $0x8] sm:$0xff] %vm3030_vm8, %v2777_v44  ;;  %v1523_v44 = vmax.f32 %v1141_v14, 0.0  ;;  %v2683_v57 = vmul.f32 %v4980_v16, %v2548_v13  ;;  %vm2424_vm3 = vcmp.eq.f32.partialorder %v3707_v12, %v4973_v18  ;;  %v1530_v22 = vmax.f32 %v1170_v19, 0.0 }
 0x186   : > { %3034 = vst.msk [vmem:[%s5045_s30 + $0x18] sm:$0xff] %vm3030_vm8, %v2781_v56  ;;  %v1133_v56 = vadd.f32 %v4959_v36, %v4928_v8  ;;  %v5136_v8 = vpop.f32.mrf.mxu1  ;;  %v3717_v12 = vunpack.i.h.bf16 %v4540_v31  ;;  %vm2430_vm5 = vcmp.eq.f32.partialorder %v3722_v41, %v4973_v18  ;;  %v1186_v31 = vadd.f32 %v4959_v36, %v5086_v34 }
 0x187   : > { %2858 = vadd.xlane.f32.xlu1 %v2688_v58  ;;  %v2554_v43 = vsel %vm2426_vm1, %v1523_v44, 0.0  ;;  %v2692_v58 = vmul.f32 %v4980_v16, %v2557_v1  ;;  %v1528_v1 = vmax.f32 %v1162_v48, 0.0  ;;  %v3732_v34 = vunpack.i.h.bf16 %v4542_v17 }
 0x188   : > { %v2787_v10 = vpop.xlane.xlu1 %2786  ;;  %2852 = vadd.xlane.f32.xlu0 %v2685_v2  ;;  %v1521_v14 = vmax.f32 %v1133_v56, 0.0  ;;  %v3507_v2 = vpop.f32.mrf.mxu0  ;;  %v2689_v13 = vmul.f32 %v4980_v16, %v2554_v43  ;;  %v1149_v56 = vadd.f32 %v4959_v36, %v4999_v20  ;;  %vm2428_vm7 = vcmp.eq.f32.partialorder %v3717_v12, %v4973_v18 }
 0x189   : > { %v2909_v61 = vpop.xlane.xlu0 %2908  ;;  %3037 = vst.msk [vmem:[%s5045_s30 + $0x30] sm:$0xff] %vm3030_vm8, %v2787_v10  ;;  %v1157_v10 = vadd.f32 %v4959_v36, %v4984_v38  ;;  %v5154_v38 = vpop.f32.mrf.mxu1  ;;  %v2559_v39 = vsel %vm2431_vm9, %v1528_v1, 0.0  ;;  %v1165_v17 = vadd.f32 %v4959_v36, %v5068_v51  ;;  %vm2434_vm10 = vcmp.eq.f32.partialorder %v3732_v34, %v4973_v18 }
 0x18a   : > { %3098 = vst.msk [vmem:[%s5045_s30 + $0x218] sm:$0xff] %vm3030_vm8, %v2909_v61  ;;  %v2552_v44 = vsel %vm2424_vm3, %v1521_v14, 0.0  ;;  %v1193_v60 = vpop.f32.mrf.mxu0  ;;  %v1525_v43 = vmax.f32 %v1149_v56, 0.0  ;;  %v1173_v14 = vadd.f32 %v4959_v36, %v5051_v26  ;;  %v3727_v56 = vunpack.i.h.bf16 %v4544_v37 }
 0x18b   : > { %2854 = vadd.xlane.f32.xlu1 %v2686_v7  ;;  %v1527_v35 = vmax.f32 %v1157_v10, 0.0  ;;  %v5170_v20 = vpop.f32.mrf.mxu1  ;;  %v2561_v7 = vsel %vm2433_vm6, %v1530_v22, 0.0  ;;  %v2687_v19 = vmul.f32 %v4980_v16, %v2552_v44  ;;  %v2694_v24 = vmul.f32 %v4980_v16, %v2559_v39 }
 0x18c   : > { %v2915_v32 = vpop.xlane.xlu1 %2914  ;;  %2848 = vadd.xlane.f32.xlu0 %v2683_v57  ;;  %v2696_v41 = vmul.f32 %v4980_v16, %v2561_v7  ;;  %v2556_v48 = vsel %vm2428_vm7, %v1525_v43, 0.0  ;;  %v3508_v44 = vpop.f32.mrf.mxu0  ;;  %v1532_v47 = vmax.f32 %v1178_v33, 0.0  ;;  %v1529_v1 = vmax.f32 %v1165_v17, 0.0 }
 0x18d   : > { %v2905_v50 = vpop.xlane.xlu0 %2904  ;;  %3101 = vst.msk [vmem:[%s5045_s30 + $0x230] sm:$0xff] %vm3030_vm8, %v2915_v32  ;;  %v2558_v57 = vsel %vm2430_vm5, %v1527_v35, 0.0  ;;  %v5186_v26 = vpop.f32.mrf.mxu1  ;;  %v2691_v37 = vmul.f32 %v4980_v16, %v2556_v48  ;;  %vm2432_vm12 = vcmp.eq.f32.partialorder %v3727_v56, %v4973_v18  ;;  %v3751_v43 = vunpack.i.l.bf16 %v4550_v28 }
 0x18e   : > { %3096 = vst.msk [vmem:[%s5045_s30 + $0x208] sm:$0xff] %vm3030_vm8, %v2905_v50  ;;  %v2693_v22 = vmul.f32 %v4980_v16, %v2558_v57  ;;  %v2560_v39 = vsel %vm2432_vm12, %v1529_v1, 0.0  ;;  %v3737_v48 = vunpack.i.h.bf16 %v4548_v59 }
 0x18f   : > { %2866 = vadd.xlane.f32.xlu1 %v2692_v58  ;;  %v1534_v58 = vmax.f32 %v1186_v31, 0.0  ;;  %v5200_v51 = vpop.f32.mrf.mxu1  ;;  %v1189_v31 = vadd.f32 %v4959_v36, %v5122_v0  ;;  %vm2441_vm15 = vcmp.eq.f32.partialorder %v3751_v43, %v4973_v18 }
 0x190   : > { %v2783_v61 = vpop.xlane.xlu1 %2782  ;;  %2860 = vadd.xlane.f32.xlu0 %v2689_v13  ;;  %v1531_v13 = vmax.f32 %v1173_v14, 0.0  ;;  %vm2436_vm0 = vcmp.eq.f32.partialorder %v3737_v48, %v4973_v18  ;;  %v1373_v48 = vadd.f32 %v4959_v36, %v5082_v6  ;;  %v3857_v6 = vunpack.i.h.bf16 %v4892_v42 }
 0x191   : > { %v2789_v15 = vpop.xlane.xlu0 %2788  ;;  %3035 = vst.msk [vmem:[%s5045_s30 + $0x20] sm:$0xff] %vm3030_vm8, %v2783_v61  ;;  %v5215_v0 = vpop.f32.mrf.mxu1 }
 0x192   : > { %3038 = vst.msk [vmem:[%s5045_s30 + $0x38] sm:$0xff] %vm3030_vm8, %v2789_v15  ;;  %v3741_v15 = vunpack.i.l.bf16 %v4546_v25  ;;  %v2562_v7 = vsel %vm2434_vm10, %v1531_v13, 0.0  ;;  %vm2484_vm7 = vcmp.eq.f32.partialorder %v3857_v6, %v4973_v18 }
 0x193   : > { %2862 = vadd.xlane.f32.xlu1 %v2690_v3  ;;  %v1202_v3 = vadd.f32 %v4959_v36, %v3507_v2  ;;  %v3742_v2 = vunpack.i.h.bf16 %v4546_v25  ;;  %v1535_v25 = vmax.f32 %v1189_v31, 0.0 }
 0x194   : > { %v2911_v32 = vpop.xlane.xlu1 %2910  ;;  %2856 = vadd.xlane.f32.xlu0 %v2687_v19  ;;  %vm2437_vm11 = vcmp.eq.f32.partialorder %v3741_v15, %v4973_v18  ;;  %v1196_v19 = vpop.f32.mrf.mxu0  ;;  %v1194_v15 = vadd.f32 %v4959_v36, %v1193_v60  ;;  %v3746_v60 = vunpack.i.l.bf16 %v4552_v29 }
 0x195   : > { %v2917_v50 = vpop.xlane.xlu0 %2916  ;;  %3099 = vst.msk [vmem:[%s5045_s30 + $0x220] sm:$0xff] %vm3030_vm8, %v2911_v32  ;;  %v3736_v32 = vunpack.i.l.bf16 %v4548_v59  ;;  %v2565_v12 = vsel %vm2437_vm11, %v1534_v58, 0.0  ;;  %v1538_v34 = vmax.f32 %v1202_v3, 0.0  ;;  %v1181_v58 = vadd.f32 %v4959_v36, %v5140_v45  ;;  %v5230_v45 = vpop.f32.mrf.mxu1 }
 0x196   : > { %3102 = vst.msk [vmem:[%s5045_s30 + $0x238] sm:$0xff] %vm3030_vm8, %v2917_v50  ;;  %v2700_v14 = vmul.f32 %v4980_v16, %v2565_v12  ;;  %v3511_v33 = vpop.f32.mrf.mxu0  ;;  %vm2438_vm14 = vcmp.eq.f32.partialorder %v3742_v2, %v4973_v18  ;;  %v1536_v56 = vmax.f32 %v1194_v15, 0.0  ;;  %v2695_v59 = vmul.f32 %v4980_v16, %v2560_v39 }
 0x197   : > { %2874 = vadd.xlane.f32.xlu1 %v2696_v41  ;;  %vm2435_vm13 = vcmp.eq.f32.partialorder %v3736_v32, %v4973_v18  ;;  %v2697_v41 = vmul.f32 %v4980_v16, %v2562_v7  ;;  %v1218_v32 = vadd.f32 %v4959_v36, %v3511_v33  ;;  %v1205_v12 = vadd.f32 %v4959_v36, %v3508_v44 }
 0x198   : > { %v2795_v10 = vpop.xlane.xlu1 %2794  ;;  %2868 = vadd.xlane.f32.xlu0 %v2693_v22  ;;  %v3761_v7 = vunpack.i.l.bf16 %v4554_v55  ;;  %vm2439_vm1 = vcmp.eq.f32.partialorder %v3746_v60, %v4973_v18 }
 0x199   : > { %v2785_v61 = vpop.xlane.xlu0 %2784  ;;  %3041 = vst.msk [vmem:[%s5045_s30 + $0x50] sm:$0xff] %vm3030_vm8, %v2795_v10  ;;  %v2567_v44 = vsel %vm2439_vm1, %v1536_v56, 0.0  ;;  %v1542_v2 = vmax.f32 %v1218_v32, 0.0 }
 0x19a   : > { %3036 = vst.msk [vmem:[%s5045_s30 + $0x28] sm:$0xff] %vm3030_vm8, %v2785_v61  ;;  %v2563_v61 = vsel %vm2435_vm13, %v1532_v47, 0.0  ;;  %v1209_v47 = vpop.f32.mrf.mxu0  ;;  %vm2445_vm3 = vcmp.eq.f32.partialorder %v3761_v7, %v4973_v18  ;;  %v2702_v39 = vmul.f32 %v4980_v16, %v2567_v44  ;;  %v3762_v7 = vunpack.i.h.bf16 %v4554_v55 }
 0x19b   : > { %2870 = vadd.xlane.f32.xlu1 %v2694_v24  ;;  %v2698_v13 = vmul.f32 %v4980_v16, %v2563_v61  ;;  %v2566_v24 = vsel %vm2438_vm14, %v1535_v25, 0.0  ;;  %v1210_v43 = vadd.f32 %v4959_v36, %v1209_v47  ;;  %v1197_v61 = vadd.f32 %v4959_v36, %v1196_v19 }
 0x19c   : > { %v2923_v35 = vpop.xlane.xlu1 %2922  ;;  %2864 = vadd.xlane.f32.xlu0 %v2691_v37  ;;  %v3752_v37 = vunpack.i.h.bf16 %v4550_v28  ;;  %v1539_v28 = vmax.f32 %v1205_v12, 0.0  ;;  %v1370_v25 = vadd.f32 %v4959_v36, %v5049_v5  ;;  %v3856_v5 = vunpack.i.l.bf16 %v4892_v42 }
 0x19d   : > { %3105 = vst.msk [vmem:[%s5045_s30 + $0x250] sm:$0xff] %vm3030_vm8, %v2923_v35  ;;  %v2913_v50 = vpop.xlane.xlu0 %2912  ;;  %v2569_v35 = vsel %vm2441_vm15, %v1538_v34, 0.0  ;;  %v3747_v34 = vunpack.i.h.bf16 %v4552_v29  ;;  %v1540_v29 = vmax.f32 %v1210_v43, 0.0  ;;  %v1581_v47 = vmax.f32 %v1373_v48, 0.0 }
 0x19e   : > { %3100 = vst.msk [vmem:[%s5045_s30 + $0x228] sm:$0xff] %vm3030_vm8, %v2913_v50  ;;  %v1533_v50 = vmax.f32 %v1181_v58, 0.0  ;;  %v2704_v1 = vmul.f32 %v4980_v16, %v2569_v35  ;;  %vm2442_vm2 = vcmp.eq.f32.partialorder %v3752_v37, %v4973_v18  ;;  %v2573_v58 = vsel %vm2445_vm3, %v1542_v2, 0.0 }
 0x19f   : > { %2882 = vadd.xlane.f32.xlu1 %v2700_v14  ;;  %v2701_v14 = vmul.f32 %v4980_v16, %v2566_v24  ;;  %v2570_v60 = vsel %vm2442_vm2, %v1539_v28, 0.0  ;;  %vm2440_vm4 = vcmp.eq.f32.partialorder %v3747_v34, %v4973_v18  ;;  %v1378_v35 = vadd.f32 %v4959_v36, %v5025_v53 }
 0x1a0   : > { %v2791_v57 = vpop.xlane.xlu1 %2790  ;;  %2876 = vadd.xlane.f32.xlu0 %v2697_v41  ;;  %v3756_v41 = vunpack.i.l.bf16 %v4556_v30  ;;  %v2708_v56 = vmul.f32 %v4980_v16, %v2573_v58  ;;  %v1580_v32 = vmax.f32 %v1370_v25, 0.0  ;;  %v3861_v42 = vunpack.i.l.bf16 %v4890_v63 }
 0x1a1   : > { %3039 = vst.msk [vmem:[%s5045_s30 + $0x40] sm:$0xff] %vm3030_vm8, %v2791_v57  ;;  %v2797_v10 = vpop.xlane.xlu0 %2796  ;;  %v5244_v57 = vpop.f32.mrf.mxu1  ;;  %vm2483_vm6 = vcmp.eq.f32.partialorder %v3856_v5, %v4973_v18  ;;  %v1386_v43 = vadd.f32 %v4959_v36, %v5118_v9  ;;  %v3866_v9 = vunpack.i.l.bf16 %v4911_v46  ;;  %vm2446_vm10 = vcmp.eq.f32.partialorder %v3762_v7, %v4973_v18 }
 0x1a2   : > { %3042 = vst.msk [vmem:[%s5045_s30 + $0x58] sm:$0xff] %vm3030_vm8, %v2797_v10  ;;  %v2564_v10 = vsel %vm2436_vm0, %v1533_v50, 0.0  ;;  %vm2443_vm5 = vcmp.eq.f32.partialorder %v3756_v41, %v4973_v18  ;;  %v2705_v50 = vmul.f32 %v4980_v16, %v2570_v60  ;;  %v2611_v2 = vsel %vm2483_vm6, %v1580_v32, 0.0 }
 0x1a3   : > { %2878 = vadd.xlane.f32.xlu1 %v2698_v13  ;;  %v5260_v19 = vpop.f32.mrf.mxu1  ;;  %v2699_v33 = vmul.f32 %v4980_v16, %v2564_v10  ;;  %v1537_v13 = vmax.f32 %v1197_v61, 0.0  ;;  %v2571_v24 = vsel %vm2443_vm5, %v1540_v29, 0.0  ;;  %v2612_v10 = vsel %vm2484_vm7, %v1581_v47, 0.0 }
 0x1a4   : > { %v2919_v22 = vpop.xlane.xlu1 %2918  ;;  %2872 = vadd.xlane.f32.xlu0 %v2695_v59  ;;  %v2706_v44 = vmul.f32 %v4980_v16, %v2571_v24  ;;  %v3757_v41 = vunpack.i.h.bf16 %v4556_v30  ;;  %vm2485_vm9 = vcmp.eq.f32.partialorder %v3861_v42, %v4973_v18  ;;  %v1394_v58 = vadd.f32 %v4959_v36, %v5100_v11 }
 0x1a5   : > { %3103 = vst.msk [vmem:[%s5045_s30 + $0x240] sm:$0xff] %vm3030_vm8, %v2919_v22  ;;  %v2925_v17 = vpop.xlane.xlu0 %2924  ;;  %v5274_v59 = vpop.f32.mrf.mxu1  ;;  %v1584_v30 = vmax.f32 %v1386_v43, 0.0  ;;  %v2747_v29 = vmul.f32 %v4980_v16, %v2612_v10  ;;  %v3862_v5 = vunpack.i.h.bf16 %v4890_v63  ;;  %vm2487_vm12 = vcmp.eq.f32.partialorder %v3866_v9, %v4973_v18 }
 0x1a6   : > { %3106 = vst.msk [vmem:[%s5045_s30 + $0x258] sm:$0xff] %vm3030_vm8, %v2925_v17  ;;  %v3512_v17 = vpop.f32.mrf.mxu0  ;;  %vm5310_vm11 = vcmp.eq.f32.partialorder %v3757_v41, %v4973_v18  ;;  %v1586_v6 = vmax.f32 %v1394_v58, 0.0  ;;  %v1402_v24 = vadd.f32 %v4959_v36, %v5186_v26  ;;  %v1389_v63 = vadd.f32 %v4959_v36, %v5154_v38 }
 0x1a7   : > { %2890 = vadd.xlane.f32.xlu1 %v2704_v1  ;;  %v1221_v37 = vadd.f32 %v4959_v36, %v3512_v17  ;;  %v5289_v55 = vpop.f32.mrf.mxu1  ;;  %v2615_v32 = vsel %vm2487_vm12, %v1584_v30, 0.0  ;;  %v3876_v7 = vunpack.i.l.bf16 %v4933_v49  ;;  %vm2486_vm13 = vcmp.eq.f32.partialorder %v3862_v5, %v4973_v18 }
 0x1a8   : > { %v2803_v3 = vpop.xlane.xlu1 %2802  ;;  %2884 = vadd.xlane.f32.xlu0 %v2701_v14  ;;  %v1212_v1 = vpop.f32.mrf.mxu0  ;;  %v2750_v26 = vmul.f32 %v4980_v16, %v2615_v32  ;;  %v1410_v42 = vadd.f32 %v4959_v36, %v5170_v20  ;;  %v1585_v43 = vmax.f32 %v1389_v63, 0.0  ;;  %v3881_v20 = vunpack.i.l.bf16 %v4931_v52 }
 0x1a9   : > { %3045 = vst.msk [vmem:[%s5045_s30 + $0x70] sm:$0xff] %vm3030_vm8, %v2803_v3  ;;  %v2793_v31 = vpop.xlane.xlu0 %2792  ;;  %v2568_v3 = vsel %vm2440_vm4, %v1537_v13, 0.0  ;;  %v1543_v28 = vmax.f32 %v1221_v37, 0.0  ;;  %v1213_v61 = vadd.f32 %v4959_v36, %v1212_v1  ;;  %v3867_v37 = vunpack.i.h.bf16 %v4911_v46 }
 0x1aa   : > { %3040 = vst.msk [vmem:[%s5045_s30 + $0x48] sm:$0xff] %vm3030_vm8, %v2793_v31  ;;  %v1582_v31 = vmax.f32 %v1378_v35, 0.0  ;;  %v2703_v14 = vmul.f32 %v4980_v16, %v2568_v3  ;;  %v5667_v35 = vld [vmem:[#allocation2_spill] sm:$0xff]  ;;  %vm2491_vm0 = vcmp.eq.f32.partialorder %v3876_v7, %v4973_v18  ;;  %v1418_v41 = vadd.f32 %v4959_v36, %v5244_v57 }
 0x1ab   : > { %2886 = vadd.xlane.f32.xlu1 %v2702_v39  ;;  %v2746_v39 = vmul.f32 %v4980_v16, %v2611_v2  ;;  %v2574_v48 = vsel %vm2446_vm10, %v1543_v28, 0.0  ;;  %v1541_v60 = vmax.f32 %v1213_v61, 0.0  ;;  %v1397_v2 = vadd.f32 %v4959_v36, %v5136_v8 }
 0x1ac   : > { %v2931_v15 = vpop.xlane.xlu1 %2930  ;;  %2880 = vadd.xlane.f32.xlu0 %v2699_v33  ;;  %v2613_v25 = vsel %vm2485_vm9, %v1582_v31, 0.0  ;;  %v1381_v33 = vadd.f32 %v4959_v36, %v5064_v40  ;;  %v1588_v31 = vmax.f32 %v1402_v24, 0.0  ;;  %v3872_v10 = vunpack.i.h.bf16 %v5667_v35 }
 0x1ad   : > { %3109 = vst.msk [vmem:[%s5045_s30 + $0x270] sm:$0xff] %vm3030_vm8, %v2931_v15  ;;  %v2921_v22 = vpop.xlane.xlu0 %2920  ;;  %v2748_v40 = vmul.f32 %v4980_v16, %v2613_v25  ;;  %v2572_v3 = vsel %vm5310_vm11, %v1541_v60, 0.0  ;;  %vm2488_vm15 = vcmp.eq.f32.partialorder %v3867_v37, %v4973_v18  ;;  %v1405_v58 = vadd.f32 %v4959_v36, %v5215_v0 }
 0x1ae   : > { %3104 = vst.msk [vmem:[%s5045_s30 + $0x248] sm:$0xff] %vm3030_vm8, %v2921_v22  ;;  %v5307_v22 = vpop.f32.mrf.mxu1  ;;  %v2707_v46 = vmul.f32 %v4980_v16, %v2572_v3  ;;  %v2616_v25 = vsel %vm2488_vm15, %v1585_v43, 0.0  ;;  %vm2490_vm1 = vcmp.eq.f32.partialorder %v3872_v10, %v4973_v18  ;;  %vm2493_vm2 = vcmp.eq.f32.partialorder %v3881_v20, %v4973_v18  ;;  %v5417_v20 = vld [vmem:[%s5654_s1] ss:$0 sm:$0xff] }
 0x1af   : > { %2898 = vadd.xlane.f32.xlu1 %v2708_v56  ;;  %v3871_v56 = vunpack.i.l.bf16 %v5667_v35  ;;  %v1426_v0 = vadd.f32 %v4959_v36, %v5230_v45  ;;  %v1592_v17 = vmax.f32 %v1418_v41, 0.0  ;;  %v1413_v5 = vadd.f32 %v4959_v36, %v5200_v51 }
 0x1b0   : > { %v2799_v12 = vpop.xlane.xlu1 %2798  ;;  %2892 = vadd.xlane.f32.xlu0 %v2705_v50  ;;  %v2709_v50 = vmul.f32 %v4980_v16, %v2574_v48  ;;  %v5327_v47 = vpop.f32.mrf.mxu1  ;;  %v3886_v48 = vunpack.i.l.bf16 %v4952_v54  ;;  %v1589_v35 = vmax.f32 %v1405_v58, 0.0  ;;  %v3891_v32 = vunpack.i.l.bf16 %v4950_v21 }
 0x1b1   : > { %3043 = vst.msk [vmem:[%s5045_s30 + $0x60] sm:$0xff] %vm3030_vm8, %v2799_v12  ;;  %v2805_v53 = vpop.xlane.xlu0 %2804  ;;  %v1583_v12 = vmax.f32 %v1381_v33, 0.0  ;;  %vm2489_vm14 = vcmp.eq.f32.partialorder %v3871_v56, %v4973_v18  ;;  %v1594_v51 = vmax.f32 %v1426_v0, 0.0  ;;  %v1591_v63 = vmax.f32 %v1413_v5, 0.0 }
 0x1b2   : > { %3046 = vst.msk [vmem:[%s5045_s30 + $0x78] sm:$0xff] %vm3030_vm8, %v2805_v53  ;;  %v2617_v1 = vsel %vm2489_vm14, %v1586_v6, 0.0  ;;  %vm2495_vm4 = vcmp.eq.f32.partialorder %v3886_v48, %v4973_v18  ;;  %v1421_v37 = vadd.f32 %v4959_v36, %v5274_v59  ;;  %v3887_v7 = vunpack.i.h.bf16 %v4952_v54  ;;  %v5403_v59 = vld [vmem:[%s5656_s3] ss:$0 sm:$0xff] }
 0x1b3   : > { %2894 = vadd.xlane.f32.xlu1 %v2706_v44  ;;  %v2614_v44 = vsel %vm2486_vm13, %v1583_v12, 0.0  ;;  %v2752_v8 = vmul.f32 %v4980_v16, %v2617_v1  ;;  %v1434_v12 = vadd.f32 %v4959_v36, %v5307_v22  ;;  %vm2497_vm6 = vcmp.eq.f32.partialorder %v3891_v32, %v4973_v18 }
 0x1b4   : > { %v2927_v34 = vpop.xlane.xlu1 %2926  ;;  %2888 = vadd.xlane.f32.xlu0 %v2703_v14  ;;  %v5345_v14 = vpop.f32.mrf.mxu1  ;;  %v2749_v9 = vmul.f32 %v4980_v16, %v2614_v44  ;;  %v2625_v36 = vsel %vm2497_vm6, %v1594_v51, 0.0  ;;  %v1442_v54 = vadd.f32 %v5403_v59, %v5289_v55  ;;  %v1593_v44 = vmax.f32 %v1421_v37, 0.0 }
 0x1b5   : > { %v2933_v15 = vpop.xlane.xlu0 %2932  ;;  %3107 = vst.msk [vmem:[%s5045_s30 + $0x260] sm:$0xff] %vm3030_vm8, %v2927_v34  ;;  %v1590_v34 = vmax.f32 %v1410_v42, 0.0  ;;  %v1596_v42 = vmax.f32 %v1434_v12, 0.0  ;;  %v3892_v43 = vunpack.i.h.bf16 %v4950_v21  ;;  %vm2496_vm7 = vcmp.eq.f32.partialorder %v3887_v7, %v5417_v20  ;;  %v5426_v21 = vld [vmem:[%s5657_s4] ss:$0 sm:$0xff] }
 0x1b6   : > { %3110 = vst.msk [vmem:[%s5045_s30 + $0x278] sm:$0xff] %vm3030_vm8, %v2933_v15  ;;  %v2619_v15 = vsel %vm2491_vm0, %v1588_v31, 0.0  ;;  %v5361_v30 = vpop.f32.mrf.mxu1  ;;  %v3897_v58 = vunpack.i.h.bf16 %v4989_v23  ;;  %v3916_v37 = vunpack.i.l.bf16 %v5033_v4 }
 0x1b7   : > { %2974 = vadd.xlane.f32.xlu1 %v2746_v39  ;;  %v1587_v39 = vmax.f32 %v1397_v2, 0.0  ;;  %v2754_v60 = vmul.f32 %v4980_v16, %v2619_v15  ;;  %vm2498_vm10 = vcmp.eq.f32.partialorder %v3892_v43, %v5417_v20 }
 0x1b8   : > { %v2811_v13 = vpop.xlane.xlu1 %2810  ;;  %2976 = vadd.xlane.f32.xlu0 %v2747_v29  ;;  %v3877_v29 = vunpack.i.h.bf16 %v4933_v49  ;;  %v2751_v49 = vmul.f32 %v4980_v16, %v2616_v25  ;;  %v1449_v56 = vpop.f32.mrf.mxu1  ;;  %vm2500_vm12 = vcmp.eq.f32.partialorder %v3897_v58, %v5417_v20  ;;  %vm2507_vm0 = vcmp.eq.f32.partialorder %v3916_v37, %v5417_v20 }
 0x1b9   : > { %3049 = vst.msk [vmem:[%s5045_s30 + $0x90] sm:$0xff] %vm3030_vm8, %v2811_v13  ;;  %v2801_v11 = vpop.xlane.xlu0 %2800  ;;  %v2621_v13 = vsel %vm2493_vm2, %v1590_v34, 0.0  ;;  %v1450_v34 = vadd.f32 %v5403_v59, %v1449_v56  ;;  %v5669_v56 = vld [vmem:[#allocation4_spill] sm:$0xff] }
 0x1ba   : > { %3044 = vst.msk [vmem:[%s5045_s30 + $0x68] sm:$0xff] %vm3030_vm8, %v2801_v11  ;;  %v2618_v11 = vsel %vm2490_vm1, %v1587_v39, 0.0  ;;  %vm2492_vm3 = vcmp.eq.f32.partialorder %v3877_v29, %v4973_v18  ;;  %v2756_v24 = vmul.f32 %v4980_v16, %v2621_v13  ;;  %v1437_v39 = vadd.f32 %v5403_v59, %v5345_v14 }
 0x1bb   : > { %2978 = vadd.xlane.f32.xlu1 %v2748_v40  ;;  %v3882_v40 = vunpack.i.h.bf16 %v4931_v52  ;;  %v2753_v52 = vmul.f32 %v4980_v16, %v2618_v11  ;;  %v2620_v3 = vsel %vm2492_vm3, %v1589_v35, 0.0  ;;  %v1458_v14 = vadd.f32 %v5403_v59, %v5361_v30 }
 0x1bc   : > { %2900 = vadd.xlane.f32.xlu0 %v2709_v50  ;;  %v2939_v53 = vpop.xlane.xlu1 %2938  ;;  %v2623_v50 = vsel %vm2495_vm4, %v1592_v17, 0.0  ;;  %v1600_v13 = vmax.f32 %v1450_v34, 0.0  ;;  %v1445_v17 = vadd.f32 %v5403_v59, %v5327_v47 }
 0x1bd   : > { %3113 = vst.msk [vmem:[%s5045_s30 + $0x290] sm:$0xff] %vm3030_vm8, %v2939_v53  ;;  %v2929_v38 = vpop.xlane.xlu0 %2928  ;;  %v5391_v53 = vpop.f32.mrf.mxu1  ;;  %vm2494_vm5 = vcmp.eq.f32.partialorder %v3882_v40, %v4973_v18  ;;  %v2758_v1 = vmul.f32 %v4980_v16, %v2623_v50  ;;  %v2755_v18 = vmul.f32 %v4980_v16, %v2620_v3  ;;  %v3911_v40 = vunpack.i.l.bf16 %v5669_v56 }
 0x1be   : > { %3108 = vst.msk [vmem:[%s5045_s30 + $0x268] sm:$0xff] %vm3030_vm8, %v2929_v38  ;;  %v2622_v31 = vsel %vm2494_vm5, %v1591_v63, 0.0  ;;  %v1602_v47 = vmax.f32 %v1458_v14, 0.0  ;;  %v1599_v51 = vmax.f32 %v1445_v17, 0.0 }
 0x1bf   : > { %2982 = vadd.xlane.f32.xlu1 %v2750_v26  ;;  %v3896_v26 = vunpack.i.l.bf16 %v4989_v23  ;;  %v1452_v2 = vpop.f32.mrf.mxu1  ;;  %v2757_v15 = vmul.f32 %v5426_v21, %v2622_v31  ;;  %vm2505_vm15 = vcmp.eq.f32.partialorder %v3911_v40, %v5417_v20 }
 0x1c0   : > { %2896 = vadd.xlane.f32.xlu0 %v2707_v46  ;;  %v2807_v28 = vpop.xlane.xlu1 %2806  ;;  %v1429_v46 = vadd.f32 %v5403_v59, %v5260_v19  ;;  %v2760_v19 = vmul.f32 %v5426_v21, %v2625_v36  ;;  %v1453_v12 = vadd.f32 %v5403_v59, %v1452_v2 }
 0x1c1   : > { %3047 = vst.msk [vmem:[%s5045_s30 + $0x80] sm:$0xff] %vm3030_vm8, %v2807_v28  ;;  %v2813_v61 = vpop.xlane.xlu0 %2812  ;;  %v5668_v28 = vld [vmem:[#allocation3_spill] sm:$0xff]  ;;  %vm2499_vm9 = vcmp.eq.f32.partialorder %v3896_v26, %v5417_v20  ;;  %v3575_v25 = vpop.f32.mrf.mxu1  ;;  %v2633_v26 = vsel %vm2505_vm15, %v1602_v47, 0.0 }
 0x1c2   : > { %3050 = vst.msk [vmem:[%s5045_s30 + $0x98] sm:$0xff] %vm3030_vm8, %v2813_v61  ;;  %v3901_v55 = vunpack.i.l.bf16 %v5668_v28  ;;  %v1598_v61 = vmax.f32 %v1442_v54, 0.0  ;;  %v1595_v41 = vmax.f32 %v1429_v46, 0.0  ;;  %v3902_v5 = vunpack.i.h.bf16 %v5668_v28 }
 0x1c3   : > { %2986 = vadd.xlane.f32.xlu1 %v2752_v8  ;;  %v2627_v8 = vsel %vm2499_vm9, %v1596_v42, 0.0  ;;  %v1465_v11 = vpop.f32.mrf.mxu1  ;;  %v1461_v54 = vadd.f32 %v5403_v59, %v5391_v53  ;;  %v1601_v42 = vmax.f32 %v1453_v12, 0.0  ;;  %v3912_v46 = vunpack.i.h.bf16 %v5669_v56 }
 0x1c4   : > { %2980 = vadd.xlane.f32.xlu0 %v2749_v9  ;;  %v2935_v33 = vpop.xlane.xlu1 %2934  ;;  %v2624_v9 = vsel %vm2496_vm7, %v1593_v44, 0.0  ;;  %vm2501_vm11 = vcmp.eq.f32.partialorder %v3901_v55, %v5417_v20  ;;  %v2626_v0 = vsel %vm2498_vm10, %v1595_v41, 0.0  ;;  %vm2502_vm14 = vcmp.eq.f32.partialorder %v3902_v5, %v5417_v20 }
 0x1c5   : > { %3111 = vst.msk [vmem:[%s5045_s30 + $0x280] sm:$0xff] %vm3030_vm8, %v2935_v33  ;;  %v2941_v57 = vpop.xlane.xlu0 %2940  ;;  %v3906_v33 = vunpack.i.l.bf16 %v5008_v62  ;;  %v2759_v23 = vmul.f32 %v5426_v21, %v2624_v9  ;;  %v3576_v63 = vpop.f32.mrf.mxu1  ;;  %v2630_v36 = vsel %vm2502_vm14, %v1599_v51, 0.0  ;;  %v3921_v44 = vunpack.i.l.bf16 %v5031_v27 }
 0x1c6   : > { %3114 = vst.msk [vmem:[%s5045_s30 + $0x298] sm:$0xff] %vm3030_vm8, %v2941_v57  ;;  %v2762_v57 = vmul.f32 %v5426_v21, %v2627_v8  ;;  %v2768_v43 = vmul.f32 %v5426_v21, %v2633_v26  ;;  %v2765_v28 = vmul.f32 %v5426_v21, %v2630_v36  ;;  %v1603_v55 = vmax.f32 %v1461_v54, 0.0 }
 0x1c7   : > { %2990 = vadd.xlane.f32.xlu1 %v2754_v60  ;;  %v2629_v60 = vsel %vm2501_vm11, %v1598_v61, 0.0  ;;  %vm2503_vm13 = vcmp.eq.f32.partialorder %v3906_v33, %v5417_v20  ;;  %vm2509_vm2 = vcmp.eq.f32.partialorder %v3921_v44, %v5417_v20  ;;  %vm2506_vm3 = vcmp.eq.f32.partialorder %v3912_v46, %v5417_v20 }
 0x1c8   : > { %2984 = vadd.xlane.f32.xlu0 %v2751_v49  ;;  %v2819_v6 = vpop.xlane.xlu1 %2818  ;;  %v1597_v49 = vmax.f32 %v1437_v39, 0.0  ;;  %v2631_v32 = vsel %vm2503_vm13, %v1600_v13, 0.0  ;;  %v2634_v39 = vsel %vm2506_vm3, %v1603_v55, 0.0 }
 0x1c9   : > { %3053 = vst.msk [vmem:[%s5045_s30 + $0xb0] sm:$0xff] %vm3030_vm8, %v2819_v6  ;;  %v2809_v45 = vpop.xlane.xlu0 %2808  ;;  %v2764_v6 = vmul.f32 %v5426_v21, %v2629_v60 }
 0x1ca   : > { %3048 = vst.msk [vmem:[%s5045_s30 + $0x88] sm:$0xff] %vm3030_vm8, %v2809_v45  ;;  %v1466_v45 = vadd.f32 %v5403_v59, %v1465_v11  ;;  %v2628_v50 = vsel %vm2500_vm12, %v1597_v49, 0.0 }
 0x1cb   : > { %2994 = vadd.xlane.f32.xlu1 %v2756_v24  ;;  %v2761_v24 = vmul.f32 %v5426_v21, %v2626_v0 }
 0x1cc   : > { %2988 = vadd.xlane.f32.xlu0 %v2753_v52  ;;  %v2947_v38 = vpop.xlane.xlu1 %2946  ;;  %v3907_v52 = vunpack.i.h.bf16 %v5008_v62  ;;  %v2763_v62 = vmul.f32 %v5426_v21, %v2628_v50 }
 0x1cd   : > { %3117 = vst.msk [vmem:[%s5045_s30 + $0x2b0] sm:$0xff] %vm3030_vm8, %v2947_v38  ;;  %v2937_v22 = vpop.xlane.xlu0 %2936  ;;  %v2766_v38 = vmul.f32 %v5426_v21, %v2631_v32 }
 0x1ce   : > { %3112 = vst.msk [vmem:[%s5045_s30 + $0x288] sm:$0xff] %vm3030_vm8, %v2937_v22  ;;  %v1474_v22 = vadd.f32 %v5403_v59, %v3575_v25  ;;  %vm2504_vm1 = vcmp.eq.f32.partialorder %v3907_v52, %v5417_v20  ;;  %v1477_v25 = vadd.f32 %v5403_v59, %v3576_v63 }
 0x1cf   : > { %2998 = vadd.xlane.f32.xlu1 %v2758_v1  ;;  %v1604_v1 = vmax.f32 %v1466_v45, 0.0 }
 0x1d0   : > { %2992 = vadd.xlane.f32.xlu0 %v2755_v18  ;;  %v2815_v10 = vpop.xlane.xlu1 %2814  ;;  %v1468_v18 = vpop.f32.mrf.mxu1  ;;  %v1606_v53 = vmax.f32 %v1474_v22, 0.0 }
 0x1d1   : > { %3051 = vst.msk [vmem:[%s5045_s30 + $0xa0] sm:$0xff] %vm3030_vm8, %v2815_v10  ;;  %v2821_v16 = vpop.xlane.xlu0 %2820  ;;  %v2635_v10 = vsel %vm2507_vm0, %v1604_v1, 0.0 }
 0x1d2   : > { %3054 = vst.msk [vmem:[%s5045_s30 + $0xb8] sm:$0xff] %vm3030_vm8, %v2821_v16  ;;  %v2632_v16 = vsel %vm2504_vm1, %v1601_v42, 0.0  ;;  %v2770_v34 = vmul.f32 %v5426_v21, %v2635_v10  ;;  %v2637_v41 = vsel %vm2509_vm2, %v1606_v53, 0.0 }
 0x1d3   : > { %3002 = vadd.xlane.f32.xlu1 %v2760_v19  ;;  %v1469_v19 = vadd.f32 %v5403_v59, %v1468_v18  ;;  %v2767_v9 = vmul.f32 %v5426_v21, %v2632_v16  ;;  %v2772_v33 = vmul.f32 %v5426_v21, %v2637_v41  ;;  %v2769_v59 = vmul.f32 %v5426_v21, %v2634_v39 }
 0x1d4   : > { %2996 = vadd.xlane.f32.xlu0 %v2757_v15  ;;  %v2943_v29 = vpop.xlane.xlu1 %2942  ;;  %v3917_v15 = vunpack.i.h.bf16 %v5033_v4 }
 0x1d5   : > { %3115 = vst.msk [vmem:[%s5045_s30 + $0x2a0] sm:$0xff] %vm3030_vm8, %v2943_v29  ;;  %v2949_v48 = vpop.xlane.xlu0 %2948  ;;  %v1605_v58 = vmax.f32 %v1469_v19, 0.0 }
 0x1d6   : > { %3118 = vst.msk [vmem:[%s5045_s30 + $0x2b8] sm:$0xff] %vm3030_vm8, %v2949_v48  ;;  %v3922_v48 = vunpack.i.h.bf16 %v5031_v27  ;;  %vm2508_vm4 = vcmp.eq.f32.partialorder %v3917_v15, %v5417_v20 }
 0x1d7   : > { %3006 = vadd.xlane.f32.xlu1 %v2762_v57  ;;  %v1607_v57 = vmax.f32 %v1477_v25, 0.0  ;;  %v2636_v60 = vsel %vm2508_vm4, %v1605_v58, 0.0 }
 0x1d8   : > { %3000 = vadd.xlane.f32.xlu0 %v2759_v23  ;;  %v2827_v35 = vpop.xlane.xlu1 %2826  ;;  %vm2510_vm5 = vcmp.eq.f32.partialorder %v3922_v48, %v5417_v20  ;;  %v2771_v27 = vmul.f32 %v5426_v21, %v2636_v60 }
 0x1d9   : > { %3057 = vst.msk [vmem:[%s5045_s30 + $0xd0] sm:$0xff] %vm3030_vm8, %v2827_v35  ;;  %v2817_v30 = vpop.xlane.xlu0 %2816  ;;  %v2638_v23 = vsel %vm2510_vm5, %v1607_v57, 0.0 }
 0x1da   : > { %3052 = vst.msk [vmem:[%s5045_s30 + $0xa8] sm:$0xff] %vm3030_vm8, %v2817_v30  ;;  %v2773_v49 = vmul.f32 %v5426_v21, %v2638_v23 }
 0x1db   : > { %3010 = vadd.xlane.f32.xlu1 %v2764_v6 }
 0x1dc   : > { %3004 = vadd.xlane.f32.xlu0 %v2761_v24  ;;  %v2955_v3 = vpop.xlane.xlu1 %2954 }
 0x1dd   : > { %3121 = vst.msk [vmem:[%s5045_s30 + $0x2d0] sm:$0xff] %vm3030_vm8, %v2955_v3  ;;  %v2945_v7 = vpop.xlane.xlu0 %2944 }
 0x1de   : > { %3116 = vst.msk [vmem:[%s5045_s30 + $0x2a8] sm:$0xff] %vm3030_vm8, %v2945_v7 }
 0x1df   : > { %3014 = vadd.xlane.f32.xlu1 %v2766_v38 }
 0x1e0   : > { %3008 = vadd.xlane.f32.xlu0 %v2763_v62  ;;  %v2823_v31 = vpop.xlane.xlu1 %2822 }
 0x1e1   : > { %3055 = vst.msk [vmem:[%s5045_s30 + $0xc0] sm:$0xff] %vm3030_vm8, %v2823_v31  ;;  %v2829_v2 = vpop.xlane.xlu0 %2828 }
 0x1e2   : > { %3058 = vst.msk [vmem:[%s5045_s30 + $0xd8] sm:$0xff] %vm3030_vm8, %v2829_v2 }
 0x1e3   : > { %3018 = vadd.xlane.f32.xlu1 %v2768_v43 }
 0x1e4   : > { %3012 = vadd.xlane.f32.xlu0 %v2765_v28  ;;  %v2951_v61 = vpop.xlane.xlu1 %2950 }
 0x1e5   : > { %3119 = vst.msk [vmem:[%s5045_s30 + $0x2c0] sm:$0xff] %vm3030_vm8, %v2951_v61  ;;  %v2957_v8 = vpop.xlane.xlu0 %2956 }
 0x1e6   : > { %3122 = vst.msk [vmem:[%s5045_s30 + $0x2d8] sm:$0xff] %vm3030_vm8, %v2957_v8 }
 0x1e7   : > { %3022 = vadd.xlane.f32.xlu1 %v2770_v34 }
 0x1e8   : > { %3016 = vadd.xlane.f32.xlu0 %v2767_v9  ;;  %v2835_v29 = vpop.xlane.xlu1 %2834 }
 0x1e9   : > { %3061 = vst.msk [vmem:[%s5045_s30 + $0xf0] sm:$0xff] %vm3030_vm8, %v2835_v29  ;;  %v2825_v4 = vpop.xlane.xlu0 %2824 }
 0x1ea   : > { %3056 = vst.msk [vmem:[%s5045_s30 + $0xc8] sm:$0xff] %vm3030_vm8, %v2825_v4 }
 0x1eb   : > { %3026 = vadd.xlane.f32.xlu1 %v2772_v33 }
 0x1ec   : > { %3020 = vadd.xlane.f32.xlu0 %v2769_v59  ;;  %v2963_v14 = vpop.xlane.xlu1 %2962 }
 0x1ed   : > { %3125 = vst.msk [vmem:[%s5045_s30 + $0x2f0] sm:$0xff] %vm3030_vm8, %v2963_v14  ;;  %v2953_v13 = vpop.xlane.xlu0 %2952 }
 0x1ee   : > { %3120 = vst.msk [vmem:[%s5045_s30 + $0x2c8] sm:$0xff] %vm3030_vm8, %v2953_v13 }
 0x1f0   : > { %3024 = vadd.xlane.f32.xlu0 %v2771_v27  ;;  %v2831_v0 = vpop.xlane.xlu1 %2830 }
 0x1f1   : > { %3059 = vst.msk [vmem:[%s5045_s30 + $0xe0] sm:$0xff] %vm3030_vm8, %v2831_v0  ;;  %v2837_v17 = vpop.xlane.xlu0 %2836 }
 0x1f2   : > { %3062 = vst.msk [vmem:[%s5045_s30 + $0xf8] sm:$0xff] %vm3030_vm8, %v2837_v17 }
 0x1f4   : > { %3028 = vadd.xlane.f32.xlu0 %v2773_v49  ;;  %v2959_v20 = vpop.xlane.xlu1 %2958 }
 0x1f5   : > { %3123 = vst.msk [vmem:[%s5045_s30 + $0x2e0] sm:$0xff] %vm3030_vm8, %v2959_v20  ;;  %v2965_v11 = vpop.xlane.xlu0 %2964 }
 0x1f6   : > { %3126 = vst.msk [vmem:[%s5045_s30 + $0x2f8] sm:$0xff] %vm3030_vm8, %v2965_v11 }
 0x1f8   : > { %v2843_v5 = vpop.xlane.xlu1 %2842 }
 0x1f9   : > { %3065 = vst.msk [vmem:[%s5045_s30 + $0x110] sm:$0xff] %vm3030_vm8, %v2843_v5  ;;  %v2833_v35 = vpop.xlane.xlu0 %2832 }
 0x1fa   : > { %3060 = vst.msk [vmem:[%s5045_s30 + $0xe8] sm:$0xff] %vm3030_vm8, %v2833_v35 }
 0x1fc   : > { %v2971_v56 = vpop.xlane.xlu1 %2970 }
 0x1fd   : > { %3129 = vst.msk [vmem:[%s5045_s30 + $0x310] sm:$0xff] %vm3030_vm8, %v2971_v56  ;;  %v2961_v21 = vpop.xlane.xlu0 %2960 }
 0x1fe   : > { %3124 = vst.msk [vmem:[%s5045_s30 + $0x2e8] sm:$0xff] %vm3030_vm8, %v2961_v21 }
 0x200   : > { %v2839_v40 = vpop.xlane.xlu1 %2838 }
 0x201   : > { %3063 = vst.msk [vmem:[%s5045_s30 + $0x100] sm:$0xff] %vm3030_vm8, %v2839_v40  ;;  %v2845_v30 = vpop.xlane.xlu0 %2844 }
 0x202   : > { %3066 = vst.msk [vmem:[%s5045_s30 + $0x118] sm:$0xff] %vm3030_vm8, %v2845_v30 }
 0x204   : > { %v2967_v6 = vpop.xlane.xlu1 %2966 }
 0x205   : > { %3127 = vst.msk [vmem:[%s5045_s30 + $0x300] sm:$0xff] %vm3030_vm8, %v2967_v6  ;;  %v2973_v47 = vpop.xlane.xlu0 %2972 }
 0x206   : > { %3130 = vst.msk [vmem:[%s5045_s30 + $0x318] sm:$0xff] %vm3030_vm8, %v2973_v47 }
 0x208   : > { %v2851_v32 = vpop.xlane.xlu1 %2850 }
 0x209   : > { %3069 = vst.msk [vmem:[%s5045_s30 + $0x130] sm:$0xff] %vm3030_vm8, %v2851_v32  ;;  %v2841_v45 = vpop.xlane.xlu0 %2840 }
 0x20a   : > { %3064 = vst.msk [vmem:[%s5045_s30 + $0x108] sm:$0xff] %vm3030_vm8, %v2841_v45 }
 0x20c   : > { %v2847_v24 = vpop.xlane.xlu1 %2846 }
 0x20d   : > { %3067 = vst.msk [vmem:[%s5045_s30 + $0x120] sm:$0xff] %vm3030_vm8, %v2847_v24  ;;  %v2969_v51 = vpop.xlane.xlu0 %2968 }
 0x20e   : > { %3128 = vst.msk [vmem:[%s5045_s30 + $0x308] sm:$0xff] %vm3030_vm8, %v2969_v51 }
 0x210   : > { %v2859_v50 = vpop.xlane.xlu1 %2858 }
 0x211   : > { %3073 = vst.msk [vmem:[%s5045_s30 + $0x150] sm:$0xff] %vm3030_vm8, %v2859_v50  ;;  %v2853_v12 = vpop.xlane.xlu0 %2852 }
 0x212   : > { %3070 = vst.msk [vmem:[%s5045_s30 + $0x138] sm:$0xff] %vm3030_vm8, %v2853_v12 }
 0x214   : > { %v2855_v52 = vpop.xlane.xlu1 %2854 }
 0x215   : > { %3071 = vst.msk [vmem:[%s5045_s30 + $0x140] sm:$0xff] %vm3030_vm8, %v2855_v52  ;;  %v2849_v63 = vpop.xlane.xlu0 %2848 }
 0x216   : > { %3068 = vst.msk [vmem:[%s5045_s30 + $0x128] sm:$0xff] %vm3030_vm8, %v2849_v63 }
 0x218   : > { %v2867_v3 = vpop.xlane.xlu1 %2866 }
 0x219   : > { %3077 = vst.msk [vmem:[%s5045_s30 + $0x170] sm:$0xff] %vm3030_vm8, %v2867_v3  ;;  %v2861_v37 = vpop.xlane.xlu0 %2860 }
 0x21a   : > { %3074 = vst.msk [vmem:[%s5045_s30 + $0x158] sm:$0xff] %vm3030_vm8, %v2861_v37 }
 0x21c   : > { %v2863_v7 = vpop.xlane.xlu1 %2862 }
 0x21d   : > { %3075 = vst.msk [vmem:[%s5045_s30 + $0x160] sm:$0xff] %vm3030_vm8, %v2863_v7  ;;  %v2857_v38 = vpop.xlane.xlu0 %2856 }
 0x21e   : > { %3072 = vst.msk [vmem:[%s5045_s30 + $0x148] sm:$0xff] %vm3030_vm8, %v2857_v38 }
 0x220   : > { %v2875_v26 = vpop.xlane.xlu1 %2874 }
 0x221   : > { %3081 = vst.msk [vmem:[%s5045_s30 + $0x190] sm:$0xff] %vm3030_vm8, %v2875_v26  ;;  %v2869_v22 = vpop.xlane.xlu0 %2868 }
 0x222   : > { %3078 = vst.msk [vmem:[%s5045_s30 + $0x178] sm:$0xff] %vm3030_vm8, %v2869_v22 }
 0x224   : > { %v2871_v1 = vpop.xlane.xlu1 %2870 }
 0x225   : > { %3079 = vst.msk [vmem:[%s5045_s30 + $0x180] sm:$0xff] %vm3030_vm8, %v2871_v1  ;;  %v2865_v62 = vpop.xlane.xlu0 %2864 }
 0x226   : > { %3076 = vst.msk [vmem:[%s5045_s30 + $0x168] sm:$0xff] %vm3030_vm8, %v2865_v62 }
 0x228   : > { %v2883_v36 = vpop.xlane.xlu1 %2882 }
 0x229   : > { %3085 = vst.msk [vmem:[%s5045_s30 + $0x1b0] sm:$0xff] %vm3030_vm8, %v2883_v36  ;;  %v2877_v54 = vpop.xlane.xlu0 %2876 }
 0x22a   : > { %3082 = vst.msk [vmem:[%s5045_s30 + $0x198] sm:$0xff] %vm3030_vm8, %v2877_v54 }
 0x22c   : > { %v2879_v42 = vpop.xlane.xlu1 %2878 }
 0x22d   : > { %3083 = vst.msk [vmem:[%s5045_s30 + $0x1a0] sm:$0xff] %vm3030_vm8, %v2879_v42  ;;  %v2873_v18 = vpop.xlane.xlu0 %2872 }
 0x22e   : > { %3080 = vst.msk [vmem:[%s5045_s30 + $0x188] sm:$0xff] %vm3030_vm8, %v2873_v18 }
 0x230   : > { %v2891_v31 = vpop.xlane.xlu1 %2890 }
 0x231   : > { %3089 = vst.msk [vmem:[%s5045_s30 + $0x1d0] sm:$0xff] %vm3030_vm8, %v2891_v31  ;;  %v2885_v46 = vpop.xlane.xlu0 %2884 }
 0x232   : > { %3086 = vst.msk [vmem:[%s5045_s30 + $0x1b8] sm:$0xff] %vm3030_vm8, %v2885_v46 }
 0x234   : > { %v2887_v44 = vpop.xlane.xlu1 %2886 }
 0x235   : > { %3087 = vst.msk [vmem:[%s5045_s30 + $0x1c0] sm:$0xff] %vm3030_vm8, %v2887_v44  ;;  %v2881_v2 = vpop.xlane.xlu0 %2880 }
 0x236   : > { %3084 = vst.msk [vmem:[%s5045_s30 + $0x1a8] sm:$0xff] %vm3030_vm8, %v2881_v2 }
 0x238   : > { %v2899_v43 = vpop.xlane.xlu1 %2898 }
 0x239   : > { %3093 = vst.msk [vmem:[%s5045_s30 + $0x1f0] sm:$0xff] %vm3030_vm8, %v2899_v43  ;;  %v2893_v53 = vpop.xlane.xlu0 %2892 }
 0x23a   : > { %3090 = vst.msk [vmem:[%s5045_s30 + $0x1d8] sm:$0xff] %vm3030_vm8, %v2893_v53 }
 0x23c   : > { %v2895_v10 = vpop.xlane.xlu1 %2894 }
 0x23d   : > { %3091 = vst.msk [vmem:[%s5045_s30 + $0x1e0] sm:$0xff] %vm3030_vm8, %v2895_v10  ;;  %v2889_v28 = vpop.xlane.xlu0 %2888 }
 0x23e   : > { %3088 = vst.msk [vmem:[%s5045_s30 + $0x1c8] sm:$0xff] %vm3030_vm8, %v2889_v28 }
 0x240   : > { %v2975_v55 = vpop.xlane.xlu1 %2974 }
 0x241   : > { %3131 = vst.msk [vmem:[%s5045_s30 + $0x320] sm:$0xff] %vm3030_vm8, %v2975_v55  ;;  %v2977_v16 = vpop.xlane.xlu0 %2976 }
 0x242   : > { %3132 = vst.msk [vmem:[%s5045_s30 + $0x328] sm:$0xff] %vm3030_vm8, %v2977_v16 }
 0x244   : > { %v2979_v19 = vpop.xlane.xlu1 %2978 }
 0x245   : > { %3133 = vst.msk [vmem:[%s5045_s30 + $0x330] sm:$0xff] %vm3030_vm8, %v2979_v19  ;;  %v2901_v61 = vpop.xlane.xlu0 %2900 }
 0x246   : > { %3094 = vst.msk [vmem:[%s5045_s30 + $0x1f8] sm:$0xff] %vm3030_vm8, %v2901_v61 }
 0x248   : > { %v2983_v8 = vpop.xlane.xlu1 %2982 }
 0x249   : > { %3135 = vst.msk [vmem:[%s5045_s30 + $0x340] sm:$0xff] %vm3030_vm8, %v2983_v8  ;;  %v2897_v34 = vpop.xlane.xlu0 %2896 }
 0x24a   : > { %3092 = vst.msk [vmem:[%s5045_s30 + $0x1e8] sm:$0xff] %vm3030_vm8, %v2897_v34 }
 0x24c   : > { %v2987_v15 = vpop.xlane.xlu1 %2986 }
 0x24d   : > { %3137 = vst.msk [vmem:[%s5045_s30 + $0x350] sm:$0xff] %vm3030_vm8, %v2987_v15  ;;  %v2981_v41 = vpop.xlane.xlu0 %2980 }
 0x24e   : > { %3134 = vst.msk [vmem:[%s5045_s30 + $0x338] sm:$0xff] %vm3030_vm8, %v2981_v41 }
 0x250   : > { %v2991_v9 = vpop.xlane.xlu1 %2990 }
 0x251   : > { %3139 = vst.msk [vmem:[%s5045_s30 + $0x360] sm:$0xff] %vm3030_vm8, %v2991_v9  ;;  %v2985_v39 = vpop.xlane.xlu0 %2984 }
 0x252   : > { %3136 = vst.msk [vmem:[%s5045_s30 + $0x348] sm:$0xff] %vm3030_vm8, %v2985_v39 }
 0x254   : > { %v2995_v25 = vpop.xlane.xlu1 %2994 }
 0x255   : > { %3141 = vst.msk [vmem:[%s5045_s30 + $0x370] sm:$0xff] %vm3030_vm8, %v2995_v25  ;;  %v2989_v58 = vpop.xlane.xlu0 %2988 }
 0x256   : > { %3138 = vst.msk [vmem:[%s5045_s30 + $0x358] sm:$0xff] %vm3030_vm8, %v2989_v58 }
 0x258   : > { %v2999_v29 = vpop.xlane.xlu1 %2998 }
 0x259   : > { %3143 = vst.msk [vmem:[%s5045_s30 + $0x380] sm:$0xff] %vm3030_vm8, %v2999_v29  ;;  %v2993_v4 = vpop.xlane.xlu0 %2992 }
 0x25a   : > { %3140 = vst.msk [vmem:[%s5045_s30 + $0x368] sm:$0xff] %vm3030_vm8, %v2993_v4 }
 0x25c   : > { %v3003_v33 = vpop.xlane.xlu1 %3002 }
 0x25d   : > { %3145 = vst.msk [vmem:[%s5045_s30 + $0x390] sm:$0xff] %vm3030_vm8, %v3003_v33  ;;  %v2997_v48 = vpop.xlane.xlu0 %2996 }
 0x25e   : > { %3142 = vst.msk [vmem:[%s5045_s30 + $0x378] sm:$0xff] %vm3030_vm8, %v2997_v48 }
 0x260   : > { %v3007_v59 = vpop.xlane.xlu1 %3006 }
 0x261   : > { %3147 = vst.msk [vmem:[%s5045_s30 + $0x3a0] sm:$0xff] %vm3030_vm8, %v3007_v59  ;;  %v3001_v57 = vpop.xlane.xlu0 %3000 }
 0x262   : > { %3144 = vst.msk [vmem:[%s5045_s30 + $0x388] sm:$0xff] %vm3030_vm8, %v3001_v57 }
 0x264   : > { %v3011_v60 = vpop.xlane.xlu1 %3010 }
 0x265   : > { %3149 = vst.msk [vmem:[%s5045_s30 + $0x3b0] sm:$0xff] %vm3030_vm8, %v3011_v60  ;;  %v3005_v14 = vpop.xlane.xlu0 %3004 }
 0x266   : > { %3146 = vst.msk [vmem:[%s5045_s30 + $0x398] sm:$0xff] %vm3030_vm8, %v3005_v14 }
 0x268   : > { %v3015_v13 = vpop.xlane.xlu1 %3014 }
 0x269   : > { %3151 = vst.msk [vmem:[%s5045_s30 + $0x3c0] sm:$0xff] %vm3030_vm8, %v3015_v13  ;;  %v3009_v27 = vpop.xlane.xlu0 %3008 }
 0x26a   : > { %3148 = vst.msk [vmem:[%s5045_s30 + $0x3a8] sm:$0xff] %vm3030_vm8, %v3009_v27 }
 0x26c   : > { %v3019_v23 = vpop.xlane.xlu1 %3018 }
 0x26d   : > { %3153 = vst.msk [vmem:[%s5045_s30 + $0x3d0] sm:$0xff] %vm3030_vm8, %v3019_v23  ;;  %v3013_v0 = vpop.xlane.xlu0 %3012 }
 0x26e   : > { %3150 = vst.msk [vmem:[%s5045_s30 + $0x3b8] sm:$0xff] %vm3030_vm8, %v3013_v0 }
 0x270   : > { %v3023_v17 = vpop.xlane.xlu1 %3022 }
 0x271   : > { %3155 = vst.msk [vmem:[%s5045_s30 + $0x3e0] sm:$0xff] %vm3030_vm8, %v3023_v17  ;;  %v3017_v49 = vpop.xlane.xlu0 %3016 }
 0x272   : > { %3152 = vst.msk [vmem:[%s5045_s30 + $0x3c8] sm:$0xff] %vm3030_vm8, %v3017_v49 }
 0x274   : > { %v3027_v20 = vpop.xlane.xlu1 %3026 }
 0x275   : > { %3157 = vst.msk [vmem:[%s5045_s30 + $0x3f0] sm:$0xff] %vm3030_vm8, %v3027_v20  ;;  %v3021_v11 = vpop.xlane.xlu0 %3020 }
 0x276   : > { %3154 = vst.msk [vmem:[%s5045_s30 + $0x3d8] sm:$0xff] %vm3030_vm8, %v3021_v11 }
 0x279   : > { %v3025_v5 = vpop.xlane.xlu0 %3024 }
 0x27a   : > { %3156 = vst.msk [vmem:[%s5045_s30 + $0x3e8] sm:$0xff] %vm3030_vm8, %v3025_v5 }
 0x27d   : > { %v3029_v35 = vpop.xlane.xlu0 %3028 }
 0x27e   : > { %3158 = vst.msk [vmem:[%s5045_s30 + $0x3f8] sm:$0xff] %vm3030_vm8, %v3029_v35 }
 0x27f PF: > { %s15_s18 = sadd.s32 1, %s4070_s18  }
 0x280   : > { %p12_p4 = scmp.ge.s32.totalorder %s15_s18, 8  }
 0x282   :  { %14 = sbr.rel (!%p12_p4) target bundleno = 1 (0x1), region = 70 }

</bundles_post_ra>
